<compile_context>
chip_gen: v5e
topology: v5e:2x2
jax: 0.10.0
libtpu: 0.0.40
codegen_flags: <defaults>
</compile_context>

<pallas_src>
import math

import jax
import jax.numpy as jnp
from jax.experimental import pallas as pl
from jax.experimental.pallas import tpu as pltpu

PAD = 128            # every feature dimension is zero-padded to 128 lanes
BN_EPS = 1e-5
BM_MAX = 256         # max batch-tile rows (use 128 on v5e); 1 tile when B <= BM_MAX


# ------------------------------ packing plan --------------------------------- #

def _make_plan(enc_has_ds, dec_has_ds):
    """Static layout of the stacked weight tensor W [n_w, PAD, PAD] and the
    stacked row-vector tensor V [n_v, PAD] (bias, BN gamma/beta, Swish beta)."""
    blocks = []
    w_idx, v_idx = 0, 0
    for has_ds in list(enc_has_ds) + list(dec_has_ds):
        blk = {"wfc": w_idx, "bfc": v_idx, "gamma": v_idx + 1,
               "beta_bn": v_idx + 2, "sbeta": v_idx + 3}
        w_idx += 1
        v_idx += 4
        if has_ds:
            blk["wds"] = w_idx
            blk["bds"] = v_idx
            w_idx += 1
            v_idx += 1
        else:
            blk["wds"] = None
            blk["bds"] = None
        blocks.append(blk)
    return {
        "blocks": blocks,
        "n_enc": len(enc_has_ds),
        "w21": w_idx, "w22": w_idx + 1, "w4": w_idx + 2,
        "b21": v_idx, "b22": v_idx + 1, "b4": v_idx + 2,
        "n_w": w_idx + 3,
        "n_v": v_idx + 3,
    }


# ------------------------------ fused kernel -------------------------------- #

def _build_fused_kernel(plan, pad, weight_dtype):
    blocks = plan["blocks"]
    n_enc = plan["n_enc"]

    def kernel(x_ref, eps_ref, w_ref, v_ref, recon_ref, ml_ref):
        def row(i):                       # static slice -> [1, pad] f32
            return v_ref[i:i + 1, :]

        def linear(h, wi, bi):
            # Cast the activation to the weight dtype (bf16 by default) so the
            # MXU runs a native single-pass matmul; accumulate in f32.
            y = jnp.dot(h.astype(weight_dtype), w_ref[wi],
                        preferred_element_type=jnp.float32)
            return y + row(bi)

        def resblock(h, blk):
            y = linear(h, blk["wfc"], blk["bfc"])
            # BatchNorm1d, training mode: batch mean / biased variance.
            mean = jnp.mean(y, axis=0, keepdims=True)
            var = jnp.mean((y - mean) ** 2, axis=0, keepdims=True)
            yn = (y - mean) * jax.lax.rsqrt(var + BN_EPS) * row(blk["gamma"]) \
                + row(blk["beta_bn"])
            # Swish with trainable beta (beta replicated across lanes in V).
            out = yn * jax.nn.sigmoid(row(blk["sbeta"]) * yn)
            if blk["wds"] is not None:
                res = linear(h, blk["wds"], blk["bds"])
            else:
                res = h                   # downsample is None -> identity residual
            return out + res

        # ---- encoder ----
        h = x_ref[...]
        for blk in blocks[:n_enc]:
            h = resblock(h, blk)

        # ---- fc21 / fc22 + reparameterization (all in registers/VMEM) ----
        mu = linear(h, plan["w21"], plan["b21"])
        logvar = linear(h, plan["w22"], plan["b22"])
        z = mu + eps_ref[...] * jnp.exp(0.5 * logvar)

        # ---- decoder ----
        hd = z
        for blk in blocks[n_enc:]:
            hd = resblock(hd, blk)

        recon_ref[...] = linear(hd, plan["w4"], plan["b4"])
        # Single lane-dense [BM, 2*pad] slab: mu | logvar (sliced in wrapper).
        ml_ref[:, :pad] = mu
        ml_ref[:, pad:] = logvar

    return kernel


# ------------------------------- forward ------------------------------------ #

def vae_forward(params, x, eps, *, bm_max=BM_MAX):
    """Mirrors: mu, logvar = encode(x.view(-1, x.shape[1])); z = reparam; decode(z)."""
    pad = params["pad"]
    input_dim = params["input_dim"]
    z_dim = params["z_dim"]
    plan = params["plan"]
    W, V = params["W"], params["V"]

    h0 = x.reshape(-1, x.shape[1]).astype(jnp.float32)
    B = h0.shape[0]
    xp = jnp.pad(h0, ((0, 0), (0, pad - h0.shape[1])))
    epsp = jnp.pad(eps.astype(jnp.float32), ((0, 0), (0, pad - eps.shape[1])))

    # Batch tiling: one tile when the batch fits (exact whole-batch BN stats).
    if B <= bm_max:
        BM, Bp = B, B
    else:
        BM = bm_max
        Bp = -(-B // BM) * BM
        # TODO(synk): with n_tiles > 1 the training-mode BatchNorm statistics
        # become per-tile (and zero padding rows enter the last tile), which
        # diverges from PyTorch's whole-batch stats; add a cross-tile
        # reduction if exact parity at large batch is required.
    if Bp != B:
        xp = jnp.pad(xp, ((0, Bp - B), (0, 0)))
        epsp = jnp.pad(epsp, ((0, Bp - B), (0, 0)))
    n_tiles = Bp // BM

    kernel = _build_fused_kernel(plan, pad, W.dtype)

    in_specs = [
        pl.BlockSpec((BM, pad), lambda i: (i, 0)),             # x tile
        pl.BlockSpec((BM, pad), lambda i: (i, 0)),             # eps tile
        # Stacked weights / row-vectors: constant index_map -> DMA'd once and
        # kept VMEM-resident across batch tiles.
        pl.BlockSpec((plan["n_w"], pad, pad), lambda i: (0, 0, 0)),
        pl.BlockSpec((plan["n_v"], pad), lambda i: (0, 0)),
    ]
    out_specs = (
        pl.BlockSpec((BM, pad), lambda i: (i, 0)),             # recon
        pl.BlockSpec((BM, 2 * pad), lambda i: (i, 0)),         # mu | logvar slab
    )
    out_shape = (jax.ShapeDtypeStruct((Bp, pad), jnp.float32),
                 jax.ShapeDtypeStruct((Bp, 2 * pad), jnp.float32))

    n_matmuls = plan["n_w"]
    flops = 2 * Bp * pad * pad * n_matmuls
    bytes_accessed = (int(W.size) * W.dtype.itemsize + int(V.size) * 4
                      + 2 * Bp * pad * 4      # x + eps in
                      + Bp * pad * 4          # recon out
                      + Bp * 2 * pad * 4)     # mu|logvar out
    transcendentals = Bp * pad * (2 * len(plan["blocks"]) + 1)

    recon_p, ml_p = pl.pallas_call(
        kernel,
        grid=(n_tiles,),
        out_shape=out_shape,
        in_specs=in_specs,
        out_specs=out_specs,
        # "arbitrary": keeps a single sequential walk over batch tiles so BN
        # batch statistics are not split across cores.  On v7x, ("parallel",)
        # would use both TensorCores at the cost of per-core BN stats.
        compiler_params=pltpu.CompilerParams(
            dimension_semantics=("arbitrary",)),
        cost_estimate=pl.CostEstimate(
            flops=flops, transcendentals=transcendentals,
            bytes_accessed=bytes_accessed),
    )(xp, epsp, W, V)

    # Padded lanes are exact zeros; slice the logical ranges back out.
    return (recon_p[:B, :input_dim],
            ml_p[:B, :z_dim],
            ml_p[:B, pad:pad + z_dim])


# --------------------- deterministic parameter setup ------------------------ #

def _kaiming_normal(key, out_dim, in_dim, a=0.0):
    # torch.nn.init.kaiming_normal_(nonlinearity='leaky_relu'), fan_in mode.
    gain = math.sqrt(2.0 / (1.0 + a * a))
    std = gain / math.sqrt(in_dim)
    return std * jax.random.normal(key, (out_dim, in_dim), dtype=jnp.float32)


def _xavier_normal(key, out_dim, in_dim):
    std = math.sqrt(2.0 / (in_dim + out_dim))
    return std * jax.random.normal(key, (out_dim, in_dim), dtype=jnp.float32)


def _bias_init(key, out_dim, in_dim):
    bound = 1.0 / math.sqrt(in_dim)
    return jax.random.uniform(key, (out_dim,), minval=-bound, maxval=bound,
                              dtype=jnp.float32)


def _spectral_normalize(w_pt, key, n_iter=5, eps=1e-12):
    # torch.nn.utils.spectral_norm power iteration on W of shape (out, in).
    # TODO(synk): torch runs 1 power iteration per forward with a persistent u
    # vector; here it is applied once at parameter-setup time (5 iterations).
    u = jax.random.normal(key, (w_pt.shape[0],), dtype=jnp.float32)
    u = u / (jnp.linalg.norm(u) + eps)
    v = w_pt.T @ u
    for _ in range(n_iter):
        v = w_pt.T @ u
        v = v / (jnp.linalg.norm(v) + eps)
        u = w_pt @ v
        u = u / (jnp.linalg.norm(u) + eps)
    sigma = u @ (w_pt @ v)
    return w_pt / sigma


def init_params(key, input_dim, hidden_dim_layer0, encoder_layer_dims,
                decoder_layer_dims, hidden_dim_layer_out_z, z_dim,
                pad=PAD, weight_dtype=jnp.bfloat16):
    enc_dims = list(zip(encoder_layer_dims[:-1], encoder_layer_dims[1:]))
    dec_dims = list(zip(decoder_layer_dims[:-1], decoder_layer_dims[1:]))
    all_dims = enc_dims + dec_dims
    enc_has_ds = [i != o for i, o in enc_dims]
    dec_has_ds = [i != o for i, o in dec_dims]
    all_has_ds = enc_has_ds + dec_has_ds
    for d in (input_dim, hidden_dim_layer0, hidden_dim_layer_out_z, z_dim,
              *encoder_layer_dims, *decoder_layer_dims):
        assert d <= pad, "feature dims must be <= PAD lanes"

    plan = _make_plan(enc_has_ds, dec_has_ds)

    n_linear = len(all_dims) + sum(all_has_ds) + 3
    keys = jax.random.split(key, 3 * n_linear)
    kpos = [0]

    def take():
        k = keys[kpos[0]]
        kpos[0] += 1
        return k

    def sn_linear(in_dim, out_dim, init_fn):
        w = _spectral_normalize(init_fn(take(), out_dim, in_dim), take())
        b = _bias_init(take(), out_dim, in_dim)
        return w.T, b              # [in, out] (transposed vs PyTorch), [out]

    W = jnp.zeros((plan["n_w"], pad, pad), jnp.float32)
    V = jnp.zeros((plan["n_v"], pad), jnp.float32)

    for blk, (i_dim, o_dim), has_ds in zip(plan["blocks"], all_dims, all_has_ds):
        wT, b = sn_linear(i_dim, o_dim, _kaiming_normal)
        W = W.at[blk["wfc"], :i_dim, :o_dim].set(wT)
        V = V.at[blk["bfc"], :o_dim].set(b)
        V = V.at[blk["gamma"], :o_dim].set(1.0)   # BN gamma; pad lanes stay 0
        # beta_bn row stays all-zero.
        V = V.at[blk["sbeta"], :].set(1.0)        # trainable Swish beta = 1.0
        if has_ds:
            wTd, bd = sn_linear(i_dim, o_dim, _kaiming_normal)
            W = W.at[blk["wds"], :i_dim, :o_dim].set(wTd)
            V = V.at[blk["bds"], :o_dim].set(bd)

    w21, b21 = sn_linear(hidden_dim_layer_out_z, z_dim, _xavier_normal)
    w22, b22 = sn_linear(hidden_dim_layer_out_z, z_dim, _xavier_normal)
    w4, b4 = sn_linear(hidden_dim_layer0, input_dim, _xavier_normal)
    W = W.at[plan["w21"], :hidden_dim_layer_out_z, :z_dim].set(w21)
    W = W.at[plan["w22"], :hidden_dim_layer_out_z, :z_dim].set(w22)
    W = W.at[plan["w4"], :hidden_dim_layer0, :input_dim].set(w4)
    V = V.at[plan["b21"], :z_dim].set(b21)
    V = V.at[plan["b22"], :z_dim].set(b22)
    V = V.at[plan["b4"], :input_dim].set(b4)

    return {
        # bf16 weight stack: halves weight HBM bytes, native MXU matmuls.
        # Use weight_dtype=jnp.float32 for a bit-fidelity parity path.
        "W": W.astype(weight_dtype),
        "V": V,                               # f32 bias / BN / Swish rows
        "plan": plan,
        "input_dim": input_dim,
        "z_dim": z_dim,
        "pad": pad,
    }


# --------------------------------- main ------------------------------------- #

if __name__ == "__main__":
    # Small, consistent configuration.  batch <= BM_MAX -> single batch tile,
    # so BatchNorm uses exact whole-batch statistics.
    batch = 16
    input_dim = 32
    hidden_dim_layer0 = 64
    hidden_dim_layer_out_z = 48
    z_dim = 16
    # Middle encoder block has in_dim == out_dim -> exercises the
    # no-downsample (identity residual) path.
    encoder_layer_dims = [input_dim, 64, 64, hidden_dim_layer_out_z]
    decoder_layer_dims = [z_dim, 32, hidden_dim_layer0]

    key = jax.random.PRNGKey(0)
    k_params, k_x, k_eps = jax.random.split(key, 3)

    params = init_params(k_params, input_dim, hidden_dim_layer0,
                         encoder_layer_dims, decoder_layer_dims,
                         hidden_dim_layer_out_z, z_dim)

    x = jax.random.normal(k_x, (batch, input_dim), dtype=jnp.float32)
    # torch.randn_like(std) -> deterministic pre-drawn noise fed to the kernel.
    eps = jax.random.normal(k_eps, (batch, z_dim), dtype=jnp.float32)

    recon, mu, logvar = vae_forward(params, x, eps)
    jax.block_until_ready((recon, mu, logvar))

    assert recon.shape == (batch, input_dim)
    assert mu.shape == (batch, z_dim) and logvar.shape == (batch, z_dim)
    assert bool(jnp.all(jnp.isfinite(recon)))
    assert bool(jnp.all(jnp.isfinite(mu))) and bool(jnp.all(jnp.isfinite(logvar)))
    print("KERNEL_OK")
</pallas_src>

<mosaic_0001>
module attributes {stable_mosaic.version = 11 : i64} {
  func.func @kernel(%arg0: i32, %arg1: memref<16x128xf32, #tpu.memory_space<vmem>>, %arg2: memref<16x128xf32, #tpu.memory_space<vmem>>, %arg3: memref<12x128x128xbf16, #tpu.memory_space<vmem>>, %arg4: memref<27x128xf32, #tpu.memory_space<vmem>>, %arg5: memref<16x128xf32, #tpu.memory_space<vmem>>, %arg6: memref<16x256xf32, #tpu.memory_space<vmem>>) attributes {dimension_semantics = [#tpu.dimension_semantics<arbitrary>], iteration_bounds = array<i64: 1>, scalar_prefetch = 0 : i64, scratch_operands = 0 : i64, tpu.core_type = #tpu.core_type<tc>, window_params = [{transform_indices = @transform_0, window_bounds = array<i64: 16, 128>}, {transform_indices = @transform_1, window_bounds = array<i64: 16, 128>}, {pipeline_mode = #tpu.pipeline_mode<synchronous>, transform_indices = @transform_2, window_bounds = array<i64: 12, 128, 128>}, {pipeline_mode = #tpu.pipeline_mode<synchronous>, transform_indices = @transform_3, window_bounds = array<i64: 27, 128>}, {transform_indices = @transform_4, window_bounds = array<i64: 16, 128>}, {transform_indices = @transform_5, window_bounds = array<i64: 16, 256>}]} {
    %c0 = arith.constant 0 : index
    %c0_0 = arith.constant 0 : index
    %0 = vector.load %arg1[%c0, %c0_0] : memref<16x128xf32, #tpu.memory_space<vmem>>, vector<16x128xf32>
    %1 = arith.truncf %0 : vector<16x128xf32> to vector<16x128xbf16>
    %c0_1 = arith.constant 0 : index
    %c0_2 = arith.constant 0 : index
    %c0_3 = arith.constant 0 : index
    %2 = vector.load %arg3[%c0_1, %c0_2, %c0_3] : memref<12x128x128xbf16, #tpu.memory_space<vmem>>, vector<1x128x128xbf16>
    %3 = vector.shape_cast %2 : vector<1x128x128xbf16> to vector<128x128xbf16>
    %cst = arith.constant dense<0.000000e+00> : vector<16x128xf32>
    %4 = tpu.matmul %1, %3, %cst {dimension_numbers = #tpu.dot_dimension_numbers<[1], [0], [0], [1], [0, 0, 1, 1], [], []>} : vector<16x128xbf16>, vector<128x128xbf16>, vector<16x128xf32> -> vector<16x128xf32>
    %c0_4 = arith.constant 0 : index
    %c0_5 = arith.constant 0 : index
    %5 = vector.load %arg4[%c0_4, %c0_5] : memref<27x128xf32, #tpu.memory_space<vmem>>, vector<1x128xf32>
    %6 = vector.broadcast %5 : vector<1x128xf32> to vector<16x128xf32>
    %7 = arith.addf %4, %6 : vector<16x128xf32>
    %cst_6 = arith.constant dense<0.000000e+00> : vector<128xf32>
    %8 = vector.multi_reduction <add>, %7, %cst_6 [0] : vector<16x128xf32> to vector<128xf32>
    %9 = vector.shape_cast %8 : vector<128xf32> to vector<1x128xf32>
    %cst_7 = arith.constant 1.600000e+01 : f32
    %10 = vector.broadcast %cst_7 : f32 to vector<1x128xf32>
    %11 = arith.divf %9, %10 : vector<1x128xf32>
    %12 = vector.broadcast %11 : vector<1x128xf32> to vector<16x128xf32>
    %13 = arith.subf %7, %12 : vector<16x128xf32>
    %14 = arith.mulf %13, %13 : vector<16x128xf32>
    %cst_8 = arith.constant dense<0.000000e+00> : vector<128xf32>
    %15 = vector.multi_reduction <add>, %14, %cst_8 [0] : vector<16x128xf32> to vector<128xf32>
    %16 = vector.shape_cast %15 : vector<128xf32> to vector<1x128xf32>
    %cst_9 = arith.constant 1.600000e+01 : f32
    %17 = vector.broadcast %cst_9 : f32 to vector<1x128xf32>
    %18 = arith.divf %16, %17 : vector<1x128xf32>
    %19 = vector.broadcast %11 : vector<1x128xf32> to vector<16x128xf32>
    %20 = arith.subf %7, %19 : vector<16x128xf32>
    %cst_10 = arith.constant 9.99999974E-6 : f32
    %21 = vector.broadcast %cst_10 : f32 to vector<1x128xf32>
    %22 = arith.addf %18, %21 : vector<1x128xf32>
    %23 = math.rsqrt %22 : vector<1x128xf32>
    %24 = vector.broadcast %23 : vector<1x128xf32> to vector<16x128xf32>
    %25 = arith.mulf %20, %24 : vector<16x128xf32>
    %c1 = arith.constant 1 : index
    %c0_11 = arith.constant 0 : index
    %26 = vector.load %arg4[%c1, %c0_11] : memref<27x128xf32, #tpu.memory_space<vmem>>, vector<1x128xf32>
    %27 = vector.broadcast %26 : vector<1x128xf32> to vector<16x128xf32>
    %28 = arith.mulf %25, %27 : vector<16x128xf32>
    %c2 = arith.constant 2 : index
    %c0_12 = arith.constant 0 : index
    %29 = vector.load %arg4[%c2, %c0_12] : memref<27x128xf32, #tpu.memory_space<vmem>>, vector<1x128xf32>
    %30 = vector.broadcast %29 : vector<1x128xf32> to vector<16x128xf32>
    %31 = arith.addf %28, %30 : vector<16x128xf32>
    %c3 = arith.constant 3 : index
    %c0_13 = arith.constant 0 : index
    %32 = vector.load %arg4[%c3, %c0_13] : memref<27x128xf32, #tpu.memory_space<vmem>>, vector<1x128xf32>
    %33 = vector.broadcast %32 : vector<1x128xf32> to vector<16x128xf32>
    %34 = arith.mulf %33, %31 : vector<16x128xf32>
    %35 = arith.negf %34 : vector<16x128xf32>
    %36 = math.exp %35 : vector<16x128xf32>
    %cst_14 = arith.constant 1.000000e+00 : f32
    %37 = vector.broadcast %cst_14 : f32 to vector<16x128xf32>
    %38 = arith.addf %37, %36 : vector<16x128xf32>
    %39 = arith.divf %37, %38 : vector<16x128xf32>
    %40 = arith.mulf %31, %39 : vector<16x128xf32>
    %41 = arith.truncf %0 : vector<16x128xf32> to vector<16x128xbf16>
    %c1_15 = arith.constant 1 : index
    %c0_16 = arith.constant 0 : index
    %c0_17 = arith.constant 0 : index
    %42 = vector.load %arg3[%c1_15, %c0_16, %c0_17] : memref<12x128x128xbf16, #tpu.memory_space<vmem>>, vector<1x128x128xbf16>
    %43 = vector.shape_cast %42 : vector<1x128x128xbf16> to vector<128x128xbf16>
    %cst_18 = arith.constant dense<0.000000e+00> : vector<16x128xf32>
    %44 = tpu.matmul %41, %43, %cst_18 {dimension_numbers = #tpu.dot_dimension_numbers<[1], [0], [0], [1], [0, 0, 1, 1], [], []>} : vector<16x128xbf16>, vector<128x128xbf16>, vector<16x128xf32> -> vector<16x128xf32>
    %c4 = arith.constant 4 : index
    %c0_19 = arith.constant 0 : index
    %45 = vector.load %arg4[%c4, %c0_19] : memref<27x128xf32, #tpu.memory_space<vmem>>, vector<1x128xf32>
    %46 = vector.broadcast %45 : vector<1x128xf32> to vector<16x128xf32>
    %47 = arith.addf %44, %46 : vector<16x128xf32>
    %48 = arith.addf %40, %47 : vector<16x128xf32>
    %49 = arith.truncf %48 : vector<16x128xf32> to vector<16x128xbf16>
    %c2_20 = arith.constant 2 : index
    %c0_21 = arith.constant 0 : index
    %c0_22 = arith.constant 0 : index
    %50 = vector.load %arg3[%c2_20, %c0_21, %c0_22] : memref<12x128x128xbf16, #tpu.memory_space<vmem>>, vector<1x128x128xbf16>
    %51 = vector.shape_cast %50 : vector<1x128x128xbf16> to vector<128x128xbf16>
    %cst_23 = arith.constant dense<0.000000e+00> : vector<16x128xf32>
    %52 = tpu.matmul %49, %51, %cst_23 {dimension_numbers = #tpu.dot_dimension_numbers<[1], [0], [0], [1], [0, 0, 1, 1], [], []>} : vector<16x128xbf16>, vector<128x128xbf16>, vector<16x128xf32> -> vector<16x128xf32>
    %c5 = arith.constant 5 : index
    %c0_24 = arith.constant 0 : index
    %53 = vector.load %arg4[%c5, %c0_24] : memref<27x128xf32, #tpu.memory_space<vmem>>, vector<1x128xf32>
    %54 = vector.broadcast %53 : vector<1x128xf32> to vector<16x128xf32>
    %55 = arith.addf %52, %54 : vector<16x128xf32>
    %cst_25 = arith.constant dense<0.000000e+00> : vector<128xf32>
    %56 = vector.multi_reduction <add>, %55, %cst_25 [0] : vector<16x128xf32> to vector<128xf32>
    %57 = vector.shape_cast %56 : vector<128xf32> to vector<1x128xf32>
    %cst_26 = arith.constant 1.600000e+01 : f32
    %58 = vector.broadcast %cst_26 : f32 to vector<1x128xf32>
    %59 = arith.divf %57, %58 : vector<1x128xf32>
    %60 = vector.broadcast %59 : vector<1x128xf32> to vector<16x128xf32>
    %61 = arith.subf %55, %60 : vector<16x128xf32>
    %62 = arith.mulf %61, %61 : vector<16x128xf32>
    %cst_27 = arith.constant dense<0.000000e+00> : vector<128xf32>
    %63 = vector.multi_reduction <add>, %62, %cst_27 [0] : vector<16x128xf32> to vector<128xf32>
    %64 = vector.shape_cast %63 : vector<128xf32> to vector<1x128xf32>
    %cst_28 = arith.constant 1.600000e+01 : f32
    %65 = vector.broadcast %cst_28 : f32 to vector<1x128xf32>
    %66 = arith.divf %64, %65 : vector<1x128xf32>
    %67 = vector.broadcast %59 : vector<1x128xf32> to vector<16x128xf32>
    %68 = arith.subf %55, %67 : vector<16x128xf32>
    %cst_29 = arith.constant 9.99999974E-6 : f32
    %69 = vector.broadcast %cst_29 : f32 to vector<1x128xf32>
    %70 = arith.addf %66, %69 : vector<1x128xf32>
    %71 = math.rsqrt %70 : vector<1x128xf32>
    %72 = vector.broadcast %71 : vector<1x128xf32> to vector<16x128xf32>
    %73 = arith.mulf %68, %72 : vector<16x128xf32>
    %c6 = arith.constant 6 : index
    %c0_30 = arith.constant 0 : index
    %74 = vector.load %arg4[%c6, %c0_30] : memref<27x128xf32, #tpu.memory_space<vmem>>, vector<1x128xf32>
    %75 = vector.broadcast %74 : vector<1x128xf32> to vector<16x128xf32>
    %76 = arith.mulf %73, %75 : vector<16x128xf32>
    %c7 = arith.constant 7 : index
    %c0_31 = arith.constant 0 : index
    %77 = vector.load %arg4[%c7, %c0_31] : memref<27x128xf32, #tpu.memory_space<vmem>>, vector<1x128xf32>
    %78 = vector.broadcast %77 : vector<1x128xf32> to vector<16x128xf32>
    %79 = arith.addf %76, %78 : vector<16x128xf32>
    %c8 = arith.constant 8 : index
    %c0_32 = arith.constant 0 : index
    %80 = vector.load %arg4[%c8, %c0_32] : memref<27x128xf32, #tpu.memory_space<vmem>>, vector<1x128xf32>
    %81 = vector.broadcast %80 : vector<1x128xf32> to vector<16x128xf32>
    %82 = arith.mulf %81, %79 : vector<16x128xf32>
    %83 = arith.negf %82 : vector<16x128xf32>
    %84 = math.exp %83 : vector<16x128xf32>
    %cst_33 = arith.constant 1.000000e+00 : f32
    %85 = vector.broadcast %cst_33 : f32 to vector<16x128xf32>
    %86 = arith.addf %85, %84 : vector<16x128xf32>
    %87 = arith.divf %85, %86 : vector<16x128xf32>
    %88 = arith.mulf %79, %87 : vector<16x128xf32>
    %89 = arith.addf %88, %48 : vector<16x128xf32>
    %90 = arith.truncf %89 : vector<16x128xf32> to vector<16x128xbf16>
    %c3_34 = arith.constant 3 : index
    %c0_35 = arith.constant 0 : index
    %c0_36 = arith.constant 0 : index
    %91 = vector.load %arg3[%c3_34, %c0_35, %c0_36] : memref<12x128x128xbf16, #tpu.memory_space<vmem>>, vector<1x128x128xbf16>
    %92 = vector.shape_cast %91 : vector<1x128x128xbf16> to vector<128x128xbf16>
    %cst_37 = arith.constant dense<0.000000e+00> : vector<16x128xf32>
    %93 = tpu.matmul %90, %92, %cst_37 {dimension_numbers = #tpu.dot_dimension_numbers<[1], [0], [0], [1], [0, 0, 1, 1], [], []>} : vector<16x128xbf16>, vector<128x128xbf16>, vector<16x128xf32> -> vector<16x128xf32>
    %c9 = arith.constant 9 : index
    %c0_38 = arith.constant 0 : index
    %94 = vector.load %arg4[%c9, %c0_38] : memref<27x128xf32, #tpu.memory_space<vmem>>, vector<1x128xf32>
    %95 = vector.broadcast %94 : vector<1x128xf32> to vector<16x128xf32>
    %96 = arith.addf %93, %95 : vector<16x128xf32>
    %cst_39 = arith.constant dense<0.000000e+00> : vector<128xf32>
    %97 = vector.multi_reduction <add>, %96, %cst_39 [0] : vector<16x128xf32> to vector<128xf32>
    %98 = vector.shape_cast %97 : vector<128xf32> to vector<1x128xf32>
    %cst_40 = arith.constant 1.600000e+01 : f32
    %99 = vector.broadcast %cst_40 : f32 to vector<1x128xf32>
    %100 = arith.divf %98, %99 : vector<1x128xf32>
    %101 = vector.broadcast %100 : vector<1x128xf32> to vector<16x128xf32>
    %102 = arith.subf %96, %101 : vector<16x128xf32>
    %103 = arith.mulf %102, %102 : vector<16x128xf32>
    %cst_41 = arith.constant dense<0.000000e+00> : vector<128xf32>
    %104 = vector.multi_reduction <add>, %103, %cst_41 [0] : vector<16x128xf32> to vector<128xf32>
    %105 = vector.shape_cast %104 : vector<128xf32> to vector<1x128xf32>
    %cst_42 = arith.constant 1.600000e+01 : f32
    %106 = vector.broadcast %cst_42 : f32 to vector<1x128xf32>
    %107 = arith.divf %105, %106 : vector<1x128xf32>
    %108 = vector.broadcast %100 : vector<1x128xf32> to vector<16x128xf32>
    %109 = arith.subf %96, %108 : vector<16x128xf32>
    %cst_43 = arith.constant 9.99999974E-6 : f32
    %110 = vector.broadcast %cst_43 : f32 to vector<1x128xf32>
    %111 = arith.addf %107, %110 : vector<1x128xf32>
    %112 = math.rsqrt %111 : vector<1x128xf32>
    %113 = vector.broadcast %112 : vector<1x128xf32> to vector<16x128xf32>
    %114 = arith.mulf %109, %113 : vector<16x128xf32>
    %c10 = arith.constant 10 : index
    %c0_44 = arith.constant 0 : index
    %115 = vector.load %arg4[%c10, %c0_44] : memref<27x128xf32, #tpu.memory_space<vmem>>, vector<1x128xf32>
    %116 = vector.broadcast %115 : vector<1x128xf32> to vector<16x128xf32>
    %117 = arith.mulf %114, %116 : vector<16x128xf32>
    %c11 = arith.constant 11 : index
    %c0_45 = arith.constant 0 : index
    %118 = vector.load %arg4[%c11, %c0_45] : memref<27x128xf32, #tpu.memory_space<vmem>>, vector<1x128xf32>
    %119 = vector.broadcast %118 : vector<1x128xf32> to vector<16x128xf32>
    %120 = arith.addf %117, %119 : vector<16x128xf32>
    %c12 = arith.constant 12 : index
    %c0_46 = arith.constant 0 : index
    %121 = vector.load %arg4[%c12, %c0_46] : memref<27x128xf32, #tpu.memory_space<vmem>>, vector<1x128xf32>
    %122 = vector.broadcast %121 : vector<1x128xf32> to vector<16x128xf32>
    %123 = arith.mulf %122, %120 : vector<16x128xf32>
    %124 = arith.negf %123 : vector<16x128xf32>
    %125 = math.exp %124 : vector<16x128xf32>
    %cst_47 = arith.constant 1.000000e+00 : f32
    %126 = vector.broadcast %cst_47 : f32 to vector<16x128xf32>
    %127 = arith.addf %126, %125 : vector<16x128xf32>
    %128 = arith.divf %126, %127 : vector<16x128xf32>
    %129 = arith.mulf %120, %128 : vector<16x128xf32>
    %130 = arith.truncf %89 : vector<16x128xf32> to vector<16x128xbf16>
    %c4_48 = arith.constant 4 : index
    %c0_49 = arith.constant 0 : index
    %c0_50 = arith.constant 0 : index
    %131 = vector.load %arg3[%c4_48, %c0_49, %c0_50] : memref<12x128x128xbf16, #tpu.memory_space<vmem>>, vector<1x128x128xbf16>
    %132 = vector.shape_cast %131 : vector<1x128x128xbf16> to vector<128x128xbf16>
    %cst_51 = arith.constant dense<0.000000e+00> : vector<16x128xf32>
    %133 = tpu.matmul %130, %132, %cst_51 {dimension_numbers = #tpu.dot_dimension_numbers<[1], [0], [0], [1], [0, 0, 1, 1], [], []>} : vector<16x128xbf16>, vector<128x128xbf16>, vector<16x128xf32> -> vector<16x128xf32>
    %c13 = arith.constant 13 : index
    %c0_52 = arith.constant 0 : index
    %134 = vector.load %arg4[%c13, %c0_52] : memref<27x128xf32, #tpu.memory_space<vmem>>, vector<1x128xf32>
    %135 = vector.broadcast %134 : vector<1x128xf32> to vector<16x128xf32>
    %136 = arith.addf %133, %135 : vector<16x128xf32>
    %137 = arith.addf %129, %136 : vector<16x128xf32>
    %138 = arith.truncf %137 : vector<16x128xf32> to vector<16x128xbf16>
    %c9_53 = arith.constant 9 : index
    %c0_54 = arith.constant 0 : index
    %c0_55 = arith.constant 0 : index
    %139 = vector.load %arg3[%c9_53, %c0_54, %c0_55] : memref<12x128x128xbf16, #tpu.memory_space<vmem>>, vector<1x128x128xbf16>
    %140 = vector.shape_cast %139 : vector<1x128x128xbf16> to vector<128x128xbf16>
    %cst_56 = arith.constant dense<0.000000e+00> : vector<16x128xf32>
    %141 = tpu.matmul %138, %140, %cst_56 {dimension_numbers = #tpu.dot_dimension_numbers<[1], [0], [0], [1], [0, 0, 1, 1], [], []>} : vector<16x128xbf16>, vector<128x128xbf16>, vector<16x128xf32> -> vector<16x128xf32>
    %c24 = arith.constant 24 : index
    %c0_57 = arith.constant 0 : index
    %142 = vector.load %arg4[%c24, %c0_57] : memref<27x128xf32, #tpu.memory_space<vmem>>, vector<1x128xf32>
    %143 = vector.broadcast %142 : vector<1x128xf32> to vector<16x128xf32>
    %144 = arith.addf %141, %143 : vector<16x128xf32>
    %145 = arith.truncf %137 : vector<16x128xf32> to vector<16x128xbf16>
    %c10_58 = arith.constant 10 : index
    %c0_59 = arith.constant 0 : index
    %c0_60 = arith.constant 0 : index
    %146 = vector.load %arg3[%c10_58, %c0_59, %c0_60] : memref<12x128x128xbf16, #tpu.memory_space<vmem>>, vector<1x128x128xbf16>
    %147 = vector.shape_cast %146 : vector<1x128x128xbf16> to vector<128x128xbf16>
    %cst_61 = arith.constant dense<0.000000e+00> : vector<16x128xf32>
    %148 = tpu.matmul %145, %147, %cst_61 {dimension_numbers = #tpu.dot_dimension_numbers<[1], [0], [0], [1], [0, 0, 1, 1], [], []>} : vector<16x128xbf16>, vector<128x128xbf16>, vector<16x128xf32> -> vector<16x128xf32>
    %c25 = arith.constant 25 : index
    %c0_62 = arith.constant 0 : index
    %149 = vector.load %arg4[%c25, %c0_62] : memref<27x128xf32, #tpu.memory_space<vmem>>, vector<1x128xf32>
    %150 = vector.broadcast %149 : vector<1x128xf32> to vector<16x128xf32>
    %151 = arith.addf %148, %150 : vector<16x128xf32>
    %c0_63 = arith.constant 0 : index
    %c0_64 = arith.constant 0 : index
    %152 = vector.load %arg2[%c0_63, %c0_64] : memref<16x128xf32, #tpu.memory_space<vmem>>, vector<16x128xf32>
    %cst_65 = arith.constant 5.000000e-01 : f32
    %153 = vector.broadcast %cst_65 : f32 to vector<16x128xf32>
    %154 = arith.mulf %153, %151 : vector<16x128xf32>
    %155 = math.exp %154 : vector<16x128xf32>
    %156 = arith.mulf %152, %155 : vector<16x128xf32>
    %157 = arith.addf %144, %156 : vector<16x128xf32>
    %158 = arith.truncf %157 : vector<16x128xf32> to vector<16x128xbf16>
    %c5_66 = arith.constant 5 : index
    %c0_67 = arith.constant 0 : index
    %c0_68 = arith.constant 0 : index
    %159 = vector.load %arg3[%c5_66, %c0_67, %c0_68] : memref<12x128x128xbf16, #tpu.memory_space<vmem>>, vector<1x128x128xbf16>
    %160 = vector.shape_cast %159 : vector<1x128x128xbf16> to vector<128x128xbf16>
    %cst_69 = arith.constant dense<0.000000e+00> : vector<16x128xf32>
    %161 = tpu.matmul %158, %160, %cst_69 {dimension_numbers = #tpu.dot_dimension_numbers<[1], [0], [0], [1], [0, 0, 1, 1], [], []>} : vector<16x128xbf16>, vector<128x128xbf16>, vector<16x128xf32> -> vector<16x128xf32>
    %c14 = arith.constant 14 : index
    %c0_70 = arith.constant 0 : index
    %162 = vector.load %arg4[%c14, %c0_70] : memref<27x128xf32, #tpu.memory_space<vmem>>, vector<1x128xf32>
    %163 = vector.broadcast %162 : vector<1x128xf32> to vector<16x128xf32>
    %164 = arith.addf %161, %163 : vector<16x128xf32>
    %cst_71 = arith.constant dense<0.000000e+00> : vector<128xf32>
    %165 = vector.multi_reduction <add>, %164, %cst_71 [0] : vector<16x128xf32> to vector<128xf32>
    %166 = vector.shape_cast %165 : vector<128xf32> to vector<1x128xf32>
    %cst_72 = arith.constant 1.600000e+01 : f32
    %167 = vector.broadcast %cst_72 : f32 to vector<1x128xf32>
    %168 = arith.divf %166, %167 : vector<1x128xf32>
    %169 = vector.broadcast %168 : vector<1x128xf32> to vector<16x128xf32>
    %170 = arith.subf %164, %169 : vector<16x128xf32>
    %171 = arith.mulf %170, %170 : vector<16x128xf32>
    %cst_73 = arith.constant dense<0.000000e+00> : vector<128xf32>
    %172 = vector.multi_reduction <add>, %171, %cst_73 [0] : vector<16x128xf32> to vector<128xf32>
    %173 = vector.shape_cast %172 : vector<128xf32> to vector<1x128xf32>
    %cst_74 = arith.constant 1.600000e+01 : f32
    %174 = vector.broadcast %cst_74 : f32 to vector<1x128xf32>
    %175 = arith.divf %173, %174 : vector<1x128xf32>
    %176 = vector.broadcast %168 : vector<1x128xf32> to vector<16x128xf32>
    %177 = arith.subf %164, %176 : vector<16x128xf32>
    %cst_75 = arith.constant 9.99999974E-6 : f32
    %178 = vector.broadcast %cst_75 : f32 to vector<1x128xf32>
    %179 = arith.addf %175, %178 : vector<1x128xf32>
    %180 = math.rsqrt %179 : vector<1x128xf32>
    %181 = vector.broadcast %180 : vector<1x128xf32> to vector<16x128xf32>
    %182 = arith.mulf %177, %181 : vector<16x128xf32>
    %c15 = arith.constant 15 : index
    %c0_76 = arith.constant 0 : index
    %183 = vector.load %arg4[%c15, %c0_76] : memref<27x128xf32, #tpu.memory_space<vmem>>, vector<1x128xf32>
    %184 = vector.broadcast %183 : vector<1x128xf32> to vector<16x128xf32>
    %185 = arith.mulf %182, %184 : vector<16x128xf32>
    %c16 = arith.constant 16 : index
    %c0_77 = arith.constant 0 : index
    %186 = vector.load %arg4[%c16, %c0_77] : memref<27x128xf32, #tpu.memory_space<vmem>>, vector<1x128xf32>
    %187 = vector.broadcast %186 : vector<1x128xf32> to vector<16x128xf32>
    %188 = arith.addf %185, %187 : vector<16x128xf32>
    %c17 = arith.constant 17 : index
    %c0_78 = arith.constant 0 : index
    %189 = vector.load %arg4[%c17, %c0_78] : memref<27x128xf32, #tpu.memory_space<vmem>>, vector<1x128xf32>
    %190 = vector.broadcast %189 : vector<1x128xf32> to vector<16x128xf32>
    %191 = arith.mulf %190, %188 : vector<16x128xf32>
    %192 = arith.negf %191 : vector<16x128xf32>
    %193 = math.exp %192 : vector<16x128xf32>
    %cst_79 = arith.constant 1.000000e+00 : f32
    %194 = vector.broadcast %cst_79 : f32 to vector<16x128xf32>
    %195 = arith.addf %194, %193 : vector<16x128xf32>
    %196 = arith.divf %194, %195 : vector<16x128xf32>
    %197 = arith.mulf %188, %196 : vector<16x128xf32>
    %198 = arith.truncf %157 : vector<16x128xf32> to vector<16x128xbf16>
    %c6_80 = arith.constant 6 : index
    %c0_81 = arith.constant 0 : index
    %c0_82 = arith.constant 0 : index
    %199 = vector.load %arg3[%c6_80, %c0_81, %c0_82] : memref<12x128x128xbf16, #tpu.memory_space<vmem>>, vector<1x128x128xbf16>
    %200 = vector.shape_cast %199 : vector<1x128x128xbf16> to vector<128x128xbf16>
    %cst_83 = arith.constant dense<0.000000e+00> : vector<16x128xf32>
    %201 = tpu.matmul %198, %200, %cst_83 {dimension_numbers = #tpu.dot_dimension_numbers<[1], [0], [0], [1], [0, 0, 1, 1], [], []>} : vector<16x128xbf16>, vector<128x128xbf16>, vector<16x128xf32> -> vector<16x128xf32>
    %c18 = arith.constant 18 : index
    %c0_84 = arith.constant 0 : index
    %202 = vector.load %arg4[%c18, %c0_84] : memref<27x128xf32, #tpu.memory_space<vmem>>, vector<1x128xf32>
    %203 = vector.broadcast %202 : vector<1x128xf32> to vector<16x128xf32>
    %204 = arith.addf %201, %203 : vector<16x128xf32>
    %205 = arith.addf %197, %204 : vector<16x128xf32>
    %206 = arith.truncf %205 : vector<16x128xf32> to vector<16x128xbf16>
    %c7_85 = arith.constant 7 : index
    %c0_86 = arith.constant 0 : index
    %c0_87 = arith.constant 0 : index
    %207 = vector.load %arg3[%c7_85, %c0_86, %c0_87] : memref<12x128x128xbf16, #tpu.memory_space<vmem>>, vector<1x128x128xbf16>
    %208 = vector.shape_cast %207 : vector<1x128x128xbf16> to vector<128x128xbf16>
    %cst_88 = arith.constant dense<0.000000e+00> : vector<16x128xf32>
    %209 = tpu.matmul %206, %208, %cst_88 {dimension_numbers = #tpu.dot_dimension_numbers<[1], [0], [0], [1], [0, 0, 1, 1], [], []>} : vector<16x128xbf16>, vector<128x128xbf16>, vector<16x128xf32> -> vector<16x128xf32>
    %c19 = arith.constant 19 : index
    %c0_89 = arith.constant 0 : index
    %210 = vector.load %arg4[%c19, %c0_89] : memref<27x128xf32, #tpu.memory_space<vmem>>, vector<1x128xf32>
    %211 = vector.broadcast %210 : vector<1x128xf32> to vector<16x128xf32>
    %212 = arith.addf %209, %211 : vector<16x128xf32>
    %cst_90 = arith.constant dense<0.000000e+00> : vector<128xf32>
    %213 = vector.multi_reduction <add>, %212, %cst_90 [0] : vector<16x128xf32> to vector<128xf32>
    %214 = vector.shape_cast %213 : vector<128xf32> to vector<1x128xf32>
    %cst_91 = arith.constant 1.600000e+01 : f32
    %215 = vector.broadcast %cst_91 : f32 to vector<1x128xf32>
    %216 = arith.divf %214, %215 : vector<1x128xf32>
    %217 = vector.broadcast %216 : vector<1x128xf32> to vector<16x128xf32>
    %218 = arith.subf %212, %217 : vector<16x128xf32>
    %219 = arith.mulf %218, %218 : vector<16x128xf32>
    %cst_92 = arith.constant dense<0.000000e+00> : vector<128xf32>
    %220 = vector.multi_reduction <add>, %219, %cst_92 [0] : vector<16x128xf32> to vector<128xf32>
    %221 = vector.shape_cast %220 : vector<128xf32> to vector<1x128xf32>
    %cst_93 = arith.constant 1.600000e+01 : f32
    %222 = vector.broadcast %cst_93 : f32 to vector<1x128xf32>
    %223 = arith.divf %221, %222 : vector<1x128xf32>
    %224 = vector.broadcast %216 : vector<1x128xf32> to vector<16x128xf32>
    %225 = arith.subf %212, %224 : vector<16x128xf32>
    %cst_94 = arith.constant 9.99999974E-6 : f32
    %226 = vector.broadcast %cst_94 : f32 to vector<1x128xf32>
    %227 = arith.addf %223, %226 : vector<1x128xf32>
    %228 = math.rsqrt %227 : vector<1x128xf32>
    %229 = vector.broadcast %228 : vector<1x128xf32> to vector<16x128xf32>
    %230 = arith.mulf %225, %229 : vector<16x128xf32>
    %c20 = arith.constant 20 : index
    %c0_95 = arith.constant 0 : index
    %231 = vector.load %arg4[%c20, %c0_95] : memref<27x128xf32, #tpu.memory_space<vmem>>, vector<1x128xf32>
    %232 = vector.broadcast %231 : vector<1x128xf32> to vector<16x128xf32>
    %233 = arith.mulf %230, %232 : vector<16x128xf32>
    %c21 = arith.constant 21 : index
    %c0_96 = arith.constant 0 : index
    %234 = vector.load %arg4[%c21, %c0_96] : memref<27x128xf32, #tpu.memory_space<vmem>>, vector<1x128xf32>
    %235 = vector.broadcast %234 : vector<1x128xf32> to vector<16x128xf32>
    %236 = arith.addf %233, %235 : vector<16x128xf32>
    %c22 = arith.constant 22 : index
    %c0_97 = arith.constant 0 : index
    %237 = vector.load %arg4[%c22, %c0_97] : memref<27x128xf32, #tpu.memory_space<vmem>>, vector<1x128xf32>
    %238 = vector.broadcast %237 : vector<1x128xf32> to vector<16x128xf32>
    %239 = arith.mulf %238, %236 : vector<16x128xf32>
    %240 = arith.negf %239 : vector<16x128xf32>
    %241 = math.exp %240 : vector<16x128xf32>
    %cst_98 = arith.constant 1.000000e+00 : f32
    %242 = vector.broadcast %cst_98 : f32 to vector<16x128xf32>
    %243 = arith.addf %242, %241 : vector<16x128xf32>
    %244 = arith.divf %242, %243 : vector<16x128xf32>
    %245 = arith.mulf %236, %244 : vector<16x128xf32>
    %246 = arith.truncf %205 : vector<16x128xf32> to vector<16x128xbf16>
    %c8_99 = arith.constant 8 : index
    %c0_100 = arith.constant 0 : index
    %c0_101 = arith.constant 0 : index
    %247 = vector.load %arg3[%c8_99, %c0_100, %c0_101] : memref<12x128x128xbf16, #tpu.memory_space<vmem>>, vector<1x128x128xbf16>
    %248 = vector.shape_cast %247 : vector<1x128x128xbf16> to vector<128x128xbf16>
    %cst_102 = arith.constant dense<0.000000e+00> : vector<16x128xf32>
    %249 = tpu.matmul %246, %248, %cst_102 {dimension_numbers = #tpu.dot_dimension_numbers<[1], [0], [0], [1], [0, 0, 1, 1], [], []>} : vector<16x128xbf16>, vector<128x128xbf16>, vector<16x128xf32> -> vector<16x128xf32>
    %c23 = arith.constant 23 : index
    %c0_103 = arith.constant 0 : index
    %250 = vector.load %arg4[%c23, %c0_103] : memref<27x128xf32, #tpu.memory_space<vmem>>, vector<1x128xf32>
    %251 = vector.broadcast %250 : vector<1x128xf32> to vector<16x128xf32>
    %252 = arith.addf %249, %251 : vector<16x128xf32>
    %253 = arith.addf %245, %252 : vector<16x128xf32>
    %254 = arith.truncf %253 : vector<16x128xf32> to vector<16x128xbf16>
    %c11_104 = arith.constant 11 : index
    %c0_105 = arith.constant 0 : index
    %c0_106 = arith.constant 0 : index
    %255 = vector.load %arg3[%c11_104, %c0_105, %c0_106] : memref<12x128x128xbf16, #tpu.memory_space<vmem>>, vector<1x128x128xbf16>
    %256 = vector.shape_cast %255 : vector<1x128x128xbf16> to vector<128x128xbf16>
    %cst_107 = arith.constant dense<0.000000e+00> : vector<16x128xf32>
    %257 = tpu.matmul %254, %256, %cst_107 {dimension_numbers = #tpu.dot_dimension_numbers<[1], [0], [0], [1], [0, 0, 1, 1], [], []>} : vector<16x128xbf16>, vector<128x128xbf16>, vector<16x128xf32> -> vector<16x128xf32>
    %c26 = arith.constant 26 : index
    %c0_108 = arith.constant 0 : index
    %258 = vector.load %arg4[%c26, %c0_108] : memref<27x128xf32, #tpu.memory_space<vmem>>, vector<1x128xf32>
    %259 = vector.broadcast %258 : vector<1x128xf32> to vector<16x128xf32>
    %260 = arith.addf %257, %259 : vector<16x128xf32>
    %c0_109 = arith.constant 0 : index
    %c0_110 = arith.constant 0 : index
    %261 = vector.load %arg5[%c0_109, %c0_110] : memref<16x128xf32, #tpu.memory_space<vmem>>, vector<16x128xf32>
    tpu.vector_store %arg5[%c0_109, %c0_110], %260 {strides = array<i32>} : memref<16x128xf32, #tpu.memory_space<vmem>>, vector<16x128xf32>,
    %c0_111 = arith.constant 0 : index
    %c0_112 = arith.constant 0 : index
    %262 = vector.load %arg6[%c0_111, %c0_112] : memref<16x256xf32, #tpu.memory_space<vmem>>, vector<16x128xf32>
    tpu.vector_store %arg6[%c0_111, %c0_112], %144 {strides = array<i32>} : memref<16x256xf32, #tpu.memory_space<vmem>>, vector<16x128xf32>,
    %c0_113 = arith.constant 0 : index
    %c128 = arith.constant 128 : index
    %263 = vector.load %arg6[%c0_113, %c128] : memref<16x256xf32, #tpu.memory_space<vmem>>, vector<16x128xf32>
    tpu.vector_store %arg6[%c0_113, %c128], %151 {strides = array<i32>} : memref<16x256xf32, #tpu.memory_space<vmem>>, vector<16x128xf32>,
    return
  }
  func.func @transform_0(%arg0: i32) -> (i32, i32) {
    %c0_i32 = arith.constant 0 : i32
    %c0_i32_0 = arith.constant 0 : i32
    return %arg0, %c0_i32 : i32, i32
  }
  func.func @transform_1(%arg0: i32) -> (i32, i32) {
    %c0_i32 = arith.constant 0 : i32
    %c0_i32_0 = arith.constant 0 : i32
    return %arg0, %c0_i32 : i32, i32
  }
  func.func @transform_2(%arg0: i32) -> (i32, i32, i32) {
    %c0_i32 = arith.constant 0 : i32
    %c0_i32_0 = arith.constant 0 : i32
    %c0_i32_1 = arith.constant 0 : i32
    %c0_i32_2 = arith.constant 0 : i32
    return %c0_i32, %c0_i32_0, %c0_i32_1 : i32, i32, i32
  }
  func.func @transform_3(%arg0: i32) -> (i32, i32) {
    %c0_i32 = arith.constant 0 : i32
    %c0_i32_0 = arith.constant 0 : i32
    %c0_i32_1 = arith.constant 0 : i32
    return %c0_i32, %c0_i32_0 : i32, i32
  }
  func.func @transform_4(%arg0: i32) -> (i32, i32) {
    %c0_i32 = arith.constant 0 : i32
    %c0_i32_0 = arith.constant 0 : i32
    return %arg0, %c0_i32 : i32, i32
  }
  func.func @transform_5(%arg0: i32) -> (i32, i32) {
    %c0_i32 = arith.constant 0 : i32
    %c0_i32_0 = arith.constant 0 : i32
    return %arg0, %c0_i32 : i32, i32
  }
}

</mosaic_0001>

<bundles_post_ra>
// kernel: tpu_custom_call.1
= control target key start
LH: loop header
LB: loop body
LE: loop exit
PB: predicated region body
PF: predicated region fallthrough
CT: control target
= control target key end

     0   :  { %11 = vsyncpa [#allocation3], 0  ;;  %s2396_s0 = inlined_call_operand.hbm [shape: f32[16,128], index: 0, kind: input, shape index: {}]   ;;  %s2397_s1 = inlined_call_operand.hbm [shape: f32[16,128], index: 1, kind: input, shape index: {}]   ;;  %s2398_s2 = inlined_call_operand.hbm [shape: bf16[12,128,128], index: 2, kind: input, shape index: {}]   ;;  %s2399_s3 = inlined_call_operand.hbm [shape: f32[27,128], index: 3, kind: input, shape index: {}]   ;;  %s2400_s4 = inlined_call_operand.hbm [shape: f32[16,128], index: 4, kind: output, shape index: {0}]   ;;  %s2401_s5 = inlined_call_operand.hbm [shape: f32[16,256], index: 5, kind: output, shape index: {1}]  }
   0x1   :  { %12 = vsyncpa [#allocation6], 0 }
   0x2   :  { %13 = vsyncpa [#allocation9], 0 }
   0x3   :  { %14 = vsyncpa [#allocation4], 0 }
   0x4   :  { %15 = vsyncpa [#allocation12], 0  ;;  %s33_s20 = sshll.u32 %s2397_s1, 4  ;;  %s2303_s21 = smov [#allocation5]   ;;  %s34_s20 = int_to_ptr.hbm [resolvable:$true] %s33_s20 }
   0x5   :  { %s35_s22 = sshll.u32 %s2303_s21, 4  ;;  %s20_s25 = sshll.u32 %s2396_s0, 4  ;;  %s36_s22 = int_to_ptr.vmem [resolvable:$true] %s35_s22  ;;  %s21_s25 = int_to_ptr.hbm [resolvable:$true] %s20_s25 }
   0x6   :  { %s2304_s26 = smov 128   ;;  %s2305_s27 = smov 8  }
   0x7   :  { %41 = dma.hbm_to_vmem [thread:$0]  %s34_s20, 256, %s36_s22, [#allocation6], %s2304_s26, %s2304_s26, %s2305_s27  }
   0x8   :  { %s2306_s28 = smov [#allocation2]   ;;  %s46_s1 = sshll.u32 %s2398_s2, 4  ;;  %s47_s1 = int_to_ptr.hbm [resolvable:$true] %s46_s1 }
   0x9   :  { %s22_s29 = sshll.u32 %s2306_s28, 4  ;;  %s2307_s0 = smov [#allocation7]   ;;  %s23_s29 = int_to_ptr.vmem [resolvable:$true] %s22_s29 }
   0xa   :  { %28 = dma.hbm_to_vmem [thread:$0]  %s21_s25, 256, %s23_s29, [#allocation3], %s2304_s26, %s2304_s26, %s2305_s27  }
   0xb   :  { %s48_s7 = sshll.u32 %s2307_s0, 4  ;;  %s59_s10 = sshll.u32 %s2399_s3, 4  ;;  %s49_s7 = int_to_ptr.vmem [resolvable:$true] %s48_s7  ;;  %s60_s10 = int_to_ptr.hbm [resolvable:$true] %s59_s10 }
   0xc   :  { %s2308_s11 = smov 64   ;;  %s2309_s12 = smov 4  }
   0xd   :  { %54 = dma.hbm_to_vmem [thread:$0]  %s47_s1, 12288, %s49_s7, [#allocation6], %s2308_s11, %s2308_s11, %s2309_s12  }
   0xe   :  { %s2310_s13 = smov [#allocation8]  }
   0xf   :  { %s61_s14 = sshll.u32 %s2310_s13, 4  ;;  %s62_s14 = int_to_ptr.vmem [resolvable:$true] %s61_s14 }
  0x10   :  { %67 = dma.hbm_to_vmem [thread:$0]  %s60_s10, 512, %s62_s14, [#allocation9], %s2304_s26, %s2304_s26, %s2305_s27  }
  0x11   :  { %2293 = dma.done.wait [#allocation3], 256  }
  0x12   :  { %2294 = vsyncadd [#allocation3], 4294967040 }
  0x13   :  { %2295 = dma.done.wait [#allocation6], 12544  }
  0x14   :  { %2296 = vsyncadd [#allocation6], 4294954752 }
  0x15   :  { %2297 = dma.done.wait [#allocation9], 512  }
  0x16   :  { %2298 = vsyncadd [#allocation9], 4294966784  ;;  %v1964_v0 = vld [vmem:[#allocation7 + $0x38] sm:$0xff]  ;;  %v1963_v1 = vld [vmem:[#allocation7 + $0x30] sm:$0xff]  ;;  %v2311_v19 = vmov 16.0   ;;  %s2312_s2 = smov [#allocation11]  }
  0x17   :  { %153 = vmatpush.bf16.msra.mxu0 %v1964_v0  ;;  %v1972_v2 = vld [vmem:[#allocation7 + $0x78] sm:$0xff]  ;;  %v1971_v3 = vld [vmem:[#allocation7 + $0x70] sm:$0xff]  ;;  %v1962_v4 = vld [vmem:[#allocation7 + $0x28] sm:$0xff]  ;;  %2093 = vrcp.f32 %v2311_v19  ;;  %s1541_s3 = sshll.u32 %s2312_s2, 4  ;;  %s1543_s17 = sshll.u32 %s2401_s5, 4  ;;  %s1542_s3 = int_to_ptr.vmem [resolvable:$true] %s1541_s3  ;;  %s1544_s17 = int_to_ptr.hbm [resolvable:$true] %s1543_s17 }
  0x18   :  { %326 = vmatpush.bf16.msra.mxu1 %v1972_v2  ;;  %v1970_v5 = vld [vmem:[#allocation7 + $0x68] sm:$0xff]  ;;  %v1961_v6 = vld [vmem:[#allocation7 + $0x20] sm:$0xff]  ;;  %v1960_v8 = vld [vmem:[#allocation7 + $0x18] sm:$0xff]  ;;  %s2313_s18 = smov 256   ;;  %s2314_s19 = smov 16  }
  0x19   :  { %v1969_v7 = vld [vmem:[#allocation7 + $0x60] sm:$0xff]  ;;  %v1968_v9 = vld [vmem:[#allocation7 + $0x58] sm:$0xff]  ;;  %v1959_v10 = vld [vmem:[#allocation7 + $0x10] sm:$0xff]  ;;  %s2315_s20 = smov [#allocation10]   ;;  %s1530_s24 = sshll.u32 %s2400_s4, 4  ;;  %s1531_s24 = int_to_ptr.hbm [resolvable:$true] %s1530_s24 }
  0x1a   :  { %v1967_v11 = vld [vmem:[#allocation7 + $0x50] sm:$0xff]  ;;  %v1958_v12 = vld [vmem:[#allocation7 + $0x8] sm:$0xff]  ;;  %v1957_v14 = vld [vmem:[#allocation7] sm:$0xff]  ;;  %s1528_s21 = sshll.u32 %s2315_s20, 4  ;;  %s1529_s21 = int_to_ptr.vmem [resolvable:$true] %s1528_s21 }
  0x1b   :  { %154 = vmatpush.bf16.msra.mxu0 %v1963_v1  ;;  %v1966_v13 = vld [vmem:[#allocation7 + $0x48] sm:$0xff]  ;;  %v84_v15 = vld [vmem:[#allocation2] sm:$0xff]  ;;  %v1980_v47 = vld [vmem:[#allocation7 + $0xb8] sm:$0xff] }
  0x1c   :  { %327 = vmatpush.bf16.msra.mxu1 %v1971_v3  ;;  %v85_v16 = vld [vmem:[#allocation2 + $0x8] sm:$0xff]  ;;  %v1965_v18 = vld [vmem:[#allocation7 + $0x40] sm:$0xff]  ;;  %410 = vmatpush.bf16.msra.mxu2 %v1980_v47  ;;  %v1979_v49 = vld [vmem:[#allocation7 + $0xb0] sm:$0xff] }
  0x1d   :  { %v86_v17 = vpack.c.bf16 %v85_v16, %v84_v15  ;;  %v2094_v21 = vpop.eup %2093  ;;  %v2066_v22 = vld [vmem:[#allocation8] ss:$0 sm:$0xff]  ;;  %v1978_v54 = vld [vmem:[#allocation7 + $0xa8] sm:$0xff]  ;;  %v1976_v60 = vld [vmem:[#allocation7 + $0x98] sm:$0xff] }
  0x1e   :  { %v175_v23 = vmul.f32 16.0, %v2094_v21  ;;  %vm179_vm0 = vweird.f32 %v2094_v21  ;;  %v1977_v57 = vld [vmem:[#allocation7 + $0xa0] sm:$0xff]  ;;  %v1975_v0 = vld [vmem:[#allocation7 + $0x90] sm:$0xff] }
  0x1f   :  { %155 = vmatpush.bf16.msra.mxu0 %v1962_v4  ;;  %v2067_v63 = vld [vmem:[#allocation8 + $0x1] ss:$0 sm:$0xff]  ;;  %v2068_v4 = vld [vmem:[#allocation8 + $0x2] ss:$0 sm:$0xff] }
  0x20   :  { %328 = vmatpush.bf16.msra.mxu1 %v1970_v5  ;;  %v176_v27 = vsub.f32 1.0, %v175_v23  ;;  %411 = vmatpush.bf16.msra.mxu2 %v1979_v49 }
  0x22   :  { %v177_v30 = vmul.f32 %v2094_v21, %v176_v27 }
  0x23   :  { %156 = vmatpush.bf16.msra.mxu0 %v1961_v6 }
  0x24   :  { %329 = vmatpush.bf16.msra.mxu1 %v1969_v7  ;;  %v178_v33 = vadd.f32 %v2094_v21, %v177_v30  ;;  %412 = vmatpush.bf16.msra.mxu2 %v1978_v54  ;;  %v2069_v7 = vld [vmem:[#allocation8 + $0x3] ss:$0 sm:$0xff] }
  0x26   :  { %v2367_v36 = vsel %vm179_vm0, %v2094_v21, %v178_v33 }
  0x27   :  { %157 = vmatpush.bf16.msra.mxu0 %v1960_v8  ;;  %v1974_v8 = vld [vmem:[#allocation7 + $0x88] sm:$0xff] }
  0x28   :  { %330 = vmatpush.bf16.msra.mxu1 %v1968_v9  ;;  %413 = vmatpush.bf16.msra.mxu2 %v1977_v57 }
  0x2b   :  { %158 = vmatpush.bf16.msra.mxu0 %v1959_v10 }
  0x2c   :  { %331 = vmatpush.bf16.msra.mxu1 %v1967_v11  ;;  %414 = vmatpush.bf16.msra.mxu2 %v1976_v60 }
  0x2f   :  { %159 = vmatpush.bf16.msra.mxu0 %v1958_v12 }
  0x30   :  { %332 = vmatpush.bf16.msra.mxu1 %v1966_v13  ;;  %415 = vmatpush.bf16.msra.mxu2 %v1975_v0  ;;  %v1973_v13 = vld [vmem:[#allocation7 + $0x80] sm:$0xff] }
  0x33   :  { %160 = vmatpush.bf16.msra.mxu0 %v1957_v14 }
  0x34   :  { %333 = vmatpush.bf16.msra.mxu1 %v1965_v18  ;;  %416 = vmatpush.bf16.msra.mxu2 %v1974_v8  ;;  %v1988_v8 = vld [vmem:[#allocation7 + $0xf8] sm:$0xff] }
  0x35   :  { %579 = vmatpush.bf16.msra.mxu3 %v1988_v8 }
  0x36   :  { %161 = vmatmul.bf16.vlgmr.msra.gmra.mxu0 %v86_v17 }
  0x37   :  { %334 = vmatmul.bf16.vlgmr.msra.gmra.mxu1 %v86_v17 }
  0x38   :  { %417 = vmatpush.bf16.msra.mxu2 %v1973_v13 }
  0xb3   :  { %v162_v20 = vpop.f32.mrf.mxu0 }
  0xb4   :  { %v163_v25 = vadd.f32 %v2066_v22, %v162_v20  ;;  %v335_v20 = vpop.f32.mrf.mxu1 }
  0xbb   :  { %v164_v24 = vpop.f32.mrf.mxu0 }
  0xbc   :  { %v165_v26 = vadd.f32 %v2066_v22, %v164_v24 }
  0xbe   :  { %v167_v28 = vadd.f32 %v165_v26, %v163_v25 }
  0xc0   :  { %v168_v29 = vrot.slane %v167_v28, 4 }
  0xc2   :  { %v169_v31 = vadd.f32 %v168_v29, %v167_v28 }
  0xc4   :  { %v170_v32 = vrot.slane %v169_v31, 2 }
  0xc6   :  { %v171_v34 = vadd.f32 %v170_v32, %v169_v31 }
  0xc8   :  { %v172_v35 = vrot.slane %v171_v34, 1 }
  0xca   :  { %v173_v37 = vadd.f32 %v172_v35, %v171_v34  ;;  %v2070_v34 = vld [vmem:[#allocation8 + $0x4] ss:$0 sm:$0xff] }
  0xcc   :  { %v181_v38 = vmul.f32 %v2367_v36, %v173_v37 }
  0xce   :  { %v182_v39 = vsub.f32 %v163_v25, %v181_v38  ;;  %v183_v40 = vsub.f32 %v165_v26, %v181_v38 }
  0xd0   :  { %v184_v41 = vmul.f32 %v182_v39, %v182_v39  ;;  %v185_v42 = vmul.f32 %v183_v40, %v183_v40 }
  0xd2   :  { %v186_v43 = vadd.f32 %v185_v42, %v184_v41 }
  0xd4   :  { %v187_v44 = vrot.slane %v186_v43, 4 }
  0xd6   :  { %v188_v45 = vadd.f32 %v187_v44, %v186_v43  ;;  %v336_v44 = vadd.f32 %v2070_v34, %v335_v20  ;;  %v1993_v20 = vld [vmem:[#allocation7 + $0x120] sm:$0xff] }
  0xd8   :  { %v189_v46 = vrot.slane %v188_v45, 2 }
  0xda   :  { %v190_v48 = vadd.f32 %v189_v46, %v188_v45 }
  0xdc   :  { %v191_v50 = vrot.slane %v190_v48, 1 }
  0xde   :  { %v192_v51 = vadd.f32 %v191_v50, %v190_v48 }
  0xe0   :  { %v193_v52 = vmul.f32 %v192_v51, %v2367_v36 }
  0xe2   :  { %v194_v53 = vadd.f32 1e-05, %v193_v52  ;;  %v2071_v52 = vld [vmem:[#allocation8 + $0x5] ss:$0 sm:$0xff] }
  0xe4   :  { %2095 = vrsqrt.f32 %v194_v53  ;;  %vm201_vm2 = vweird.f32 %v194_v53 }
  0xea   :  { %v2096_v55 = vpop.eup %2095 }
  0xeb   :  { %v196_v56 = vmul.f32 %v2096_v55, %v194_v53  ;;  %vm202_vm1 = vweird.f32 %v2096_v55 }
  0xec   :  { %vm203_vm3 = vmor %vm201_vm2, %vm202_vm1 }
  0xed   :  { %v197_v58 = vmul.f32 %v2096_v55, %v196_v56 }
  0xef   :  { %v198_v59 = vmul.f32 0.5, %v197_v58 }
  0xf1   :  { %v199_v61 = vsub.f32 1.5, %v198_v59 }
  0xf3   :  { %v200_v62 = vmul.f32 %v2096_v55, %v199_v61 }
  0xf5   :  { %v204_v1 = vsel %vm203_vm3, %v2096_v55, %v200_v62 }
  0xf6   :  { %v205_v2 = vmul.f32 %v204_v1, %v182_v39  ;;  %v206_v3 = vmul.f32 %v204_v1, %v183_v40  ;;  %v337_v40 = vpop.f32.mrf.mxu1 }
  0xf7   :  { %v338_v47 = vadd.f32 %v2070_v34, %v337_v40  ;;  %v2073_v40 = vld [vmem:[#allocation8 + $0x7] ss:$0 sm:$0xff] }
  0xf8   :  { %v210_v5 = vmul.f32 %v2067_v63, %v206_v3  ;;  %v209_v6 = vmul.f32 %v2067_v63, %v205_v2 }
  0xfa   :  { %v213_v9 = vadd.f32 %v2068_v4, %v209_v6  ;;  %v214_v10 = vadd.f32 %v2068_v4, %v210_v5 }
  0xfc   :  { %v217_v11 = vmul.f32 %v2069_v7, %v213_v9  ;;  %v218_v12 = vmul.f32 %v2069_v7, %v214_v10 }
  0xfe   :  { %v1595_v14 = vmul.f32 -1.442695, %v217_v11  ;;  %v1596_v15 = vmul.f32 -1.442695, %v218_v12  ;;  %v1987_v11 = vld [vmem:[#allocation7 + $0xf0] sm:$0xff] }
  0xff   :  { %v1995_v12 = vld [vmem:[#allocation7 + $0x130] sm:$0xff]  ;;  %580 = vmatpush.bf16.msra.mxu3 %v1987_v11 }
 0x100   :  { %2097 = vpow2.f32 %v1595_v14 }
 0x101   :  { %2099 = vpow2.f32 %v1596_v15  ;;  %v1986_v15 = vld [vmem:[#allocation7 + $0xe8] sm:$0xff] }
 0x103   :  { %581 = vmatpush.bf16.msra.mxu3 %v1986_v15 }
 0x106   :  { %v2098_v16 = vpop.eup %2097 }
 0x107   :  { %v2100_v17 = vpop.eup %2099  ;;  %v225_v18 = vadd.f32 1.0, %v2098_v16  ;;  %v1994_v16 = vld [vmem:[#allocation7 + $0x128] sm:$0xff] }
 0x108   :  { %v226_v19 = vadd.f32 1.0, %v2100_v17 }
 0x109   :  { %2101 = vrcp.f32 %v225_v18  ;;  %v238_v26 = vand.u32 2147483648, %v225_v18  ;;  %v236_v29 = vand.u32 2147483647, %v225_v18  ;;  %vm232_vm6 = vweird.f32 %v225_v18 }
 0x10a   :  { %2103 = vrcp.f32 %v226_v19  ;;  %v253_v30 = vand.u32 2147483648, %v226_v19  ;;  %v251_v32 = vand.u32 2147483647, %v226_v19  ;;  %vm247_vm8 = vweird.f32 %v226_v19 }
 0x10b   :  { %v239_v35 = vor.u32 1.1754944e-38, %v238_v26  ;;  %vm237_vm9 = vcmp.eq.f32.partialorder %v236_v29, 8.507059e+37  ;;  %v1990_v29 = vld [vmem:[#allocation7 + $0x108] sm:$0xff] }
 0x10c   :  { %v254_v39 = vor.u32 1.1754944e-38, %v253_v30  ;;  %vm252_vm11 = vcmp.eq.f32.partialorder %v251_v32, 8.507059e+37  ;;  %v1981_v32 = vld [vmem:[#allocation7 + $0xc0] sm:$0xff] }
 0x10f   :  { %v2102_v21 = vpop.eup %2101 }
 0x110   :  { %v2104_v22 = vpop.eup %2103  ;;  %v228_v23 = vmul.f32 %v2102_v21, %v225_v18  ;;  %vm233_vm4 = vweird.f32 %v2102_v21 }
 0x111   :  { %v243_v24 = vmul.f32 %v2104_v22, %v226_v19  ;;  %vm248_vm5 = vweird.f32 %v2104_v22  ;;  %vm234_vm7 = vmor %vm232_vm6, %vm233_vm4  ;;  %v1985_v19 = vld [vmem:[#allocation7 + $0xe0] sm:$0xff] }
 0x112   :  { %v229_v25 = vsub.f32 1.0, %v228_v23  ;;  %vm249_vm10 = vmor %vm247_vm8, %vm248_vm5  ;;  %582 = vmatpush.bf16.msra.mxu3 %v1985_v19 }
 0x113   :  { %v244_v27 = vsub.f32 1.0, %v243_v24  ;;  %v1983_v24 = vld [vmem:[#allocation7 + $0xd0] sm:$0xff] }
 0x114   :  { %v230_v28 = vmul.f32 %v2102_v21, %v229_v25  ;;  %v1991_v25 = vld [vmem:[#allocation7 + $0x110] sm:$0xff] }
 0x115   :  { %v245_v31 = vmul.f32 %v2104_v22, %v244_v27 }
 0x116   :  { %v231_v33 = vadd.f32 %v2102_v21, %v230_v28  ;;  %v1982_v28 = vld [vmem:[#allocation7 + $0xc8] sm:$0xff] }
 0x117   :  { %v246_v37 = vadd.f32 %v2104_v22, %v245_v31 }
 0x118   :  { %v235_v38 = vsel %vm234_vm7, %v2102_v21, %v231_v33  ;;  %v1984_v21 = vld [vmem:[#allocation7 + $0xd8] sm:$0xff]  ;;  %v1989_v33 = vld [vmem:[#allocation7 + $0x100] sm:$0xff] }
 0x119   :  { %v240_v41 = vsel %vm237_vm9, %v239_v35, %v235_v38  ;;  %v250_v42 = vsel %vm249_vm10, %v2104_v22, %v246_v37  ;;  %v1992_v22 = vld [vmem:[#allocation7 + $0x118] sm:$0xff]  ;;  %583 = vmatpush.bf16.msra.mxu3 %v1984_v21  ;;  %v2072_v35 = vld [vmem:[#allocation8 + $0x6] ss:$0 sm:$0xff] }
 0x11a   :  { %v257_v43 = vmul.f32 %v240_v41, %v213_v9  ;;  %v255_v45 = vsel %vm252_vm11, %v254_v39, %v250_v42  ;;  %v1996_v9 = vld [vmem:[#allocation7 + $0x138] sm:$0xff] }
 0x11b   :  { %v258_v46 = vmul.f32 %v255_v45, %v214_v10  ;;  %745 = vmatpush.bf16.msrb.mxu0 %v1996_v9 }
 0x11c   :  { %v2371_v48 = vadd.f32 %v336_v44, %v257_v43  ;;  %v2074_v43 = vld [vmem:[#allocation8 + $0x8] ss:$0 sm:$0xff] }
 0x11d   :  { %v2373_v49 = vadd.f32 %v338_v47, %v258_v46  ;;  %584 = vmatpush.bf16.msra.mxu3 %v1983_v24 }
 0x11f   :  { %v342_v50 = vpack.c.bf16 %v2373_v49, %v2371_v48  ;;  %746 = vmatpush.bf16.msrb.mxu0 %v1995_v12 }
 0x121   :  { %418 = vmatmul.bf16.vlgmr.msra.gmra.mxu2 %v342_v50  ;;  %585 = vmatpush.bf16.msra.mxu3 %v1982_v28 }
 0x123   :  { %747 = vmatpush.bf16.msrb.mxu0 %v1994_v16 }
 0x125   :  { %586 = vmatpush.bf16.msra.mxu3 %v1981_v32 }
 0x127   :  { %748 = vmatpush.bf16.msrb.mxu0 %v1993_v20 }
 0x12b   :  { %749 = vmatpush.bf16.msrb.mxu0 %v1992_v22 }
 0x12f   :  { %750 = vmatpush.bf16.msrb.mxu0 %v1991_v25 }
 0x133   :  { %751 = vmatpush.bf16.msrb.mxu0 %v1990_v29 }
 0x137   :  { %752 = vmatpush.bf16.msrb.mxu0 %v1989_v33 }
 0x1a4   :  { %v419_v51 = vpop.f32.mrf.mxu2 }
 0x1a5   :  { %v420_v54 = vadd.f32 %v2071_v52, %v419_v51 }
 0x1ac   :  { %v421_v53 = vpop.f32.mrf.mxu2 }
 0x1ad   :  { %v422_v55 = vadd.f32 %v2071_v52, %v421_v53 }
 0x1af   :  { %v424_v56 = vadd.f32 %v422_v55, %v420_v54 }
 0x1b1   :  { %v425_v57 = vrot.slane %v424_v56, 4 }
 0x1b3   :  { %v426_v58 = vadd.f32 %v425_v57, %v424_v56 }
 0x1b5   :  { %v427_v59 = vrot.slane %v426_v58, 2 }
 0x1b7   :  { %v428_v60 = vadd.f32 %v427_v59, %v426_v58 }
 0x1b9   :  { %v429_v61 = vrot.slane %v428_v60, 1 }
 0x1bb   :  { %v430_v62 = vadd.f32 %v429_v61, %v428_v60 }
 0x1bd   :  { %v431_v63 = vmul.f32 %v430_v62, %v2367_v36 }
 0x1bf   :  { %v432_v0 = vsub.f32 %v420_v54, %v431_v63  ;;  %v433_v1 = vsub.f32 %v422_v55, %v431_v63 }
 0x1c1   :  { %v434_v2 = vmul.f32 %v432_v0, %v432_v0  ;;  %v435_v3 = vmul.f32 %v433_v1, %v433_v1 }
 0x1c3   :  { %v436_v4 = vadd.f32 %v435_v3, %v434_v2 }
 0x1c5   :  { %v437_v5 = vrot.slane %v436_v4, 4 }
 0x1c7   :  { %v438_v6 = vadd.f32 %v437_v5, %v436_v4 }
 0x1c9   :  { %v439_v7 = vrot.slane %v438_v6, 2 }
 0x1cb   :  { %v440_v10 = vadd.f32 %v439_v7, %v438_v6 }
 0x1cd   :  { %v441_v13 = vrot.slane %v440_v10, 1 }
 0x1cf   :  { %v442_v14 = vadd.f32 %v441_v13, %v440_v10 }
 0x1d1   :  { %v443_v17 = vmul.f32 %v442_v14, %v2367_v36 }
 0x1d3   :  { %v444_v18 = vadd.f32 1e-05, %v443_v17 }
 0x1d5   :  { %2105 = vrsqrt.f32 %v444_v18  ;;  %vm451_vm13 = vweird.f32 %v444_v18 }
 0x1db   :  { %v2106_v23 = vpop.eup %2105 }
 0x1dc   :  { %v446_v26 = vmul.f32 %v2106_v23, %v444_v18  ;;  %vm452_vm12 = vweird.f32 %v2106_v23  ;;  %v2076_v18 = vld [vmem:[#allocation8 + $0x9] ss:$0 sm:$0xff] }
 0x1dd   :  { %vm453_vm14 = vmor %vm451_vm13, %vm452_vm12 }
 0x1de   :  { %v447_v27 = vmul.f32 %v2106_v23, %v446_v26 }
 0x1e0   :  { %v448_v30 = vmul.f32 0.5, %v447_v27 }
 0x1e2   :  { %v449_v31 = vsub.f32 1.5, %v448_v30 }
 0x1e4   :  { %v450_v34 = vmul.f32 %v2106_v23, %v449_v31 }
 0x1e6   :  { %v454_v37 = vsel %vm453_vm14, %v2106_v23, %v450_v34 }
 0x1e7   :  { %v455_v38 = vmul.f32 %v454_v37, %v432_v0  ;;  %v456_v39 = vmul.f32 %v454_v37, %v433_v1 }
 0x1e9   :  { %v459_v41 = vmul.f32 %v2072_v35, %v455_v38  ;;  %v460_v42 = vmul.f32 %v2072_v35, %v456_v39 }
 0x1eb   :  { %v463_v44 = vadd.f32 %v2073_v40, %v459_v41  ;;  %v464_v45 = vadd.f32 %v2073_v40, %v460_v42  ;;  %v2004_v40 = vld [vmem:[#allocation7 + $0x278] sm:$0xff] }
 0x1ec   :  { %v2012_v41 = vld [vmem:[#allocation7 + $0x2b8] sm:$0xff]  ;;  %829 = vmatpush.bf16.msrb.mxu1 %v2004_v40 }
 0x1ed   :  { %v467_v46 = vmul.f32 %v2074_v43, %v463_v44  ;;  %v468_v47 = vmul.f32 %v2074_v43, %v464_v45  ;;  %910 = vmatpush.bf16.msrb.mxu2 %v2012_v41 }
 0x1ef   :  { %v1661_v50 = vmul.f32 -1.442695, %v467_v46  ;;  %v1662_v51 = vmul.f32 -1.442695, %v468_v47  ;;  %v2002_v46 = vld [vmem:[#allocation7 + $0x268] sm:$0xff] }
 0x1f0   :  { %v2010_v47 = vld [vmem:[#allocation7 + $0x2a8] sm:$0xff] }
 0x1f1   :  { %2107 = vpow2.f32 %v1661_v50  ;;  %v2001_v50 = vld [vmem:[#allocation7 + $0x260] sm:$0xff] }
 0x1f2   :  { %2109 = vpow2.f32 %v1662_v51  ;;  %v2009_v51 = vld [vmem:[#allocation7 + $0x2a0] sm:$0xff] }
 0x1f7   :  { %v2108_v52 = vpop.eup %2107 }
 0x1f8   :  { %v2110_v53 = vpop.eup %2109  ;;  %v475_v54 = vadd.f32 1.0, %v2108_v52 }
 0x1f9   :  { %v476_v55 = vadd.f32 1.0, %v2110_v53 }
 0x1fa   :  { %2111 = vrcp.f32 %v475_v54  ;;  %v488_v61 = vand.u32 2147483648, %v475_v54  ;;  %v486_v0 = vand.u32 2147483647, %v475_v54  ;;  %vm482_vm1 = vweird.f32 %v475_v54 }
 0x1fb   :  { %2113 = vrcp.f32 %v476_v55  ;;  %v503_v1 = vand.u32 2147483648, %v476_v55  ;;  %v501_v3 = vand.u32 2147483647, %v476_v55  ;;  %vm497_vm3 = vweird.f32 %v476_v55 }
 0x1fc   :  { %v489_v5 = vor.u32 1.1754944e-38, %v488_v61  ;;  %vm487_vm4 = vcmp.eq.f32.partialorder %v486_v0, 8.507059e+37  ;;  %v1998_v0 = vld [vmem:[#allocation7 + $0x248] sm:$0xff] }
 0x1fd   :  { %v504_v8 = vor.u32 1.1754944e-38, %v503_v1  ;;  %vm502_vm6 = vcmp.eq.f32.partialorder %v501_v3, 8.507059e+37  ;;  %v2006_v1 = vld [vmem:[#allocation7 + $0x288] sm:$0xff] }
 0x200   :  { %v2112_v56 = vpop.eup %2111 }
 0x201   :  { %v2114_v57 = vpop.eup %2113  ;;  %v478_v58 = vmul.f32 %v2112_v56, %v475_v54  ;;  %vm483_vm15 = vweird.f32 %v2112_v56 }
 0x202   :  { %v493_v59 = vmul.f32 %v2114_v57, %v476_v55  ;;  %vm498_vm0 = vweird.f32 %v2114_v57  ;;  %vm484_vm2 = vmor %vm482_vm1, %vm483_vm15  ;;  %v2000_v55 = vld [vmem:[#allocation7 + $0x258] sm:$0xff] }
 0x203   :  { %v479_v60 = vsub.f32 1.0, %v478_v58  ;;  %vm499_vm5 = vmor %vm497_vm3, %vm498_vm0 }
 0x204   :  { %v494_v62 = vsub.f32 1.0, %v493_v59  ;;  %v1999_v59 = vld [vmem:[#allocation7 + $0x250] sm:$0xff] }
 0x205   :  { %v480_v63 = vmul.f32 %v2112_v56, %v479_v60  ;;  %v2007_v60 = vld [vmem:[#allocation7 + $0x290] sm:$0xff] }
 0x206   :  { %v495_v2 = vmul.f32 %v2114_v57, %v494_v62  ;;  %v2077_v62 = vld [vmem:[#allocation8 + $0xa] ss:$0 sm:$0xff] }
 0x207   :  { %v481_v4 = vadd.f32 %v2112_v56, %v480_v63 }
 0x208   :  { %v496_v6 = vadd.f32 %v2114_v57, %v495_v2 }
 0x209   :  { %v485_v7 = vsel %vm484_vm2, %v2112_v56, %v481_v4  ;;  %v2008_v56 = vld [vmem:[#allocation7 + $0x298] sm:$0xff]  ;;  %v2078_v4 = vld [vmem:[#allocation8 + $0xb] ss:$0 sm:$0xff] }
 0x20a   :  { %v490_v9 = vsel %vm487_vm4, %v489_v5, %v485_v7  ;;  %v500_v10 = vsel %vm499_vm5, %v2114_v57, %v496_v6  ;;  %v2079_v7 = vld [vmem:[#allocation8 + $0xc] ss:$0 sm:$0xff] }
 0x20b   :  { %v505_v11 = vsel %vm502_vm6, %v504_v8, %v500_v10  ;;  %v507_v12 = vmul.f32 %v490_v9, %v463_v44  ;;  %v2003_v44 = vld [vmem:[#allocation7 + $0x270] sm:$0xff]  ;;  %v1997_v8 = vld [vmem:[#allocation7 + $0x240] sm:$0xff] }
 0x20c   :  { %v508_v13 = vmul.f32 %v505_v11, %v464_v45  ;;  %v2011_v45 = vld [vmem:[#allocation7 + $0x2b0] sm:$0xff]  ;;  %830 = vmatpush.bf16.msrb.mxu1 %v2003_v44  ;;  %v2005_v9 = vld [vmem:[#allocation7 + $0x280] sm:$0xff] }
 0x20d   :  { %v509_v14 = vadd.f32 %v507_v12, %v2371_v48  ;;  %911 = vmatpush.bf16.msrb.mxu2 %v2011_v45 }
 0x20e   :  { %v510_v15 = vadd.f32 %v508_v13, %v2373_v49 }
 0x210   :  { %v511_v16 = vpack.c.bf16 %v510_v15, %v509_v14  ;;  %831 = vmatpush.bf16.msrb.mxu1 %v2002_v46 }
 0x211   :  { %912 = vmatpush.bf16.msrb.mxu2 %v2010_v47 }
 0x212   :  { %587 = vmatmul.bf16.vlgmr.msra.gmra.mxu3 %v511_v16  ;;  %753 = vmatmul.bf16.vlgmr.msrb.gmra.mxu0 %v511_v16 }
 0x214   :  { %832 = vmatpush.bf16.msrb.mxu1 %v2001_v50 }
 0x215   :  { %913 = vmatpush.bf16.msrb.mxu2 %v2009_v51  ;;  %v2020_v51 = vld [vmem:[#allocation7 + $0x178] sm:$0xff] }
 0x216   :  { %1004 = vmatpush.bf16.msrb.mxu3 %v2020_v51 }
 0x218   :  { %833 = vmatpush.bf16.msrb.mxu1 %v2000_v55  ;;  %v2018_v55 = vld [vmem:[#allocation7 + $0x168] sm:$0xff] }
 0x219   :  { %914 = vmatpush.bf16.msrb.mxu2 %v2008_v56  ;;  %v2026_v56 = vld [vmem:[#allocation7 + $0x1a8] sm:$0xff] }
 0x21c   :  { %834 = vmatpush.bf16.msrb.mxu1 %v1999_v59  ;;  %v2016_v59 = vld [vmem:[#allocation7 + $0x158] sm:$0xff] }
 0x21d   :  { %915 = vmatpush.bf16.msrb.mxu2 %v2007_v60  ;;  %v2024_v60 = vld [vmem:[#allocation7 + $0x198] sm:$0xff] }
 0x220   :  { %835 = vmatpush.bf16.msrb.mxu1 %v1998_v0  ;;  %v2022_v0 = vld [vmem:[#allocation7 + $0x188] sm:$0xff] }
 0x221   :  { %916 = vmatpush.bf16.msrb.mxu2 %v2006_v1  ;;  %v2013_v1 = vld [vmem:[#allocation7 + $0x140] sm:$0xff] }
 0x224   :  { %836 = vmatpush.bf16.msrb.mxu1 %v1997_v8 }
 0x225   :  { %917 = vmatpush.bf16.msrb.mxu2 %v2005_v9 }
 0x295   :  { %v588_v17 = vpop.f32.mrf.mxu3 }
 0x296   :  { %v589_v20 = vadd.f32 %v2076_v18, %v588_v17 }
 0x29d   :  { %v590_v19 = vpop.f32.mrf.mxu3 }
 0x29e   :  { %v591_v21 = vadd.f32 %v2076_v18, %v590_v19 }
 0x2a0   :  { %v593_v22 = vadd.f32 %v591_v21, %v589_v20 }
 0x2a2   :  { %v594_v23 = vrot.slane %v593_v22, 4 }
 0x2a4   :  { %v595_v24 = vadd.f32 %v594_v23, %v593_v22 }
 0x2a6   :  { %v596_v25 = vrot.slane %v595_v24, 2 }
 0x2a8   :  { %v597_v26 = vadd.f32 %v596_v25, %v595_v24 }
 0x2aa   :  { %v598_v27 = vrot.slane %v597_v26, 1 }
 0x2ac   :  { %v599_v28 = vadd.f32 %v598_v27, %v597_v26 }
 0x2ae   :  { %v600_v29 = vmul.f32 %v599_v28, %v2367_v36 }
 0x2b0   :  { %v601_v48 = vsub.f32 %v589_v20, %v600_v29  ;;  %v602_v30 = vsub.f32 %v591_v21, %v600_v29  ;;  %v754_v20 = vpop.f32.mrf.mxu0 }
 0x2b2   :  { %v603_v49 = vmul.f32 %v601_v48, %v601_v48  ;;  %v604_v31 = vmul.f32 %v602_v30, %v602_v30 }
 0x2b4   :  { %v605_v32 = vadd.f32 %v604_v31, %v603_v49 }
 0x2b6   :  { %v606_v33 = vrot.slane %v605_v32, 4 }
 0x2b8   :  { %v607_v34 = vadd.f32 %v606_v33, %v605_v32  ;;  %v2075_v32 = vld [vmem:[#allocation8 + $0xd] ss:$0 sm:$0xff]  ;;  %v756_v33 = vpop.f32.mrf.mxu0 }
 0x2b9   :  { %v757_v41 = vadd.f32 %v2075_v32, %v756_v33  ;;  %v755_v44 = vadd.f32 %v2075_v32, %v754_v20 }
 0x2ba   :  { %v608_v35 = vrot.slane %v607_v34, 2 }
 0x2bc   :  { %v609_v37 = vadd.f32 %v608_v35, %v607_v34 }
 0x2be   :  { %v610_v38 = vrot.slane %v609_v37, 1 }
 0x2c0   :  { %v611_v39 = vadd.f32 %v610_v38, %v609_v37 }
 0x2c2   :  { %v612_v42 = vmul.f32 %v611_v39, %v2367_v36 }
 0x2c4   :  { %v613_v43 = vadd.f32 1e-05, %v612_v42 }
 0x2c6   :  { %2115 = vrsqrt.f32 %v613_v43  ;;  %vm620_vm8 = vweird.f32 %v613_v43 }
 0x2cc   :  { %v2116_v52 = vpop.eup %2115 }
 0x2cd   :  { %v615_v53 = vmul.f32 %v2116_v52, %v613_v43  ;;  %vm621_vm7 = vweird.f32 %v2116_v52 }
 0x2ce   :  { %vm622_vm9 = vmor %vm620_vm8, %vm621_vm7 }
 0x2cf   :  { %v616_v54 = vmul.f32 %v2116_v52, %v615_v53  ;;  %v2019_v53 = vld [vmem:[#allocation7 + $0x170] sm:$0xff] }
 0x2d0   :  { %1005 = vmatpush.bf16.msrb.mxu3 %v2019_v53  ;;  %v2044_v53 = vld [vmem:[#allocation7 + $0x238] sm:$0xff] }
 0x2d1   :  { %v617_v57 = vmul.f32 0.5, %v616_v54  ;;  %v2027_v54 = vld [vmem:[#allocation7 + $0x1b0] sm:$0xff]  ;;  %1420 = vmatpush.bf16.msra.mxu2 %v2044_v53 }
 0x2d3   :  { %v618_v58 = vsub.f32 1.5, %v617_v57  ;;  %v2017_v57 = vld [vmem:[#allocation7 + $0x160] sm:$0xff] }
 0x2d4   :  { %1006 = vmatpush.bf16.msrb.mxu3 %v2018_v55  ;;  %v2035_v55 = vld [vmem:[#allocation7 + $0x1f0] sm:$0xff] }
 0x2d5   :  { %v619_v61 = vmul.f32 %v2116_v52, %v618_v58  ;;  %v2025_v58 = vld [vmem:[#allocation7 + $0x1a0] sm:$0xff] }
 0x2d7   :  { %v623_v63 = vsel %vm622_vm9, %v2116_v52, %v619_v61  ;;  %v2028_v52 = vld [vmem:[#allocation7 + $0x1b8] sm:$0xff]  ;;  %v2015_v61 = vld [vmem:[#allocation7 + $0x150] sm:$0xff] }
 0x2d8   :  { %v624_v2 = vmul.f32 %v623_v63, %v601_v48  ;;  %v625_v3 = vmul.f32 %v623_v63, %v602_v30  ;;  %1170 = vmatpush.bf16.msra.mxu0 %v2028_v52  ;;  %1007 = vmatpush.bf16.msrb.mxu3 %v2017_v57  ;;  %v2014_v63 = vld [vmem:[#allocation7 + $0x148] sm:$0xff]  ;;  %v2036_v52 = vld [vmem:[#allocation7 + $0x1f8] sm:$0xff] }
 0x2d9   :  { %1254 = vmatpush.bf16.msra.mxu1 %v2036_v52  ;;  %v2034_v57 = vld [vmem:[#allocation7 + $0x1e8] sm:$0xff] }
 0x2da   :  { %v628_v5 = vmul.f32 %v2077_v62, %v624_v2  ;;  %v629_v6 = vmul.f32 %v2077_v62, %v625_v3  ;;  %v2023_v62 = vld [vmem:[#allocation7 + $0x190] sm:$0xff]  ;;  %v2021_v2 = vld [vmem:[#allocation7 + $0x180] sm:$0xff]  ;;  %v2080_v3 = vld [vmem:[#allocation8 + $0x18] ss:$0 sm:$0xff] }
 0x2dc   :  { %v633_v10 = vadd.f32 %v2078_v4, %v629_v6  ;;  %v632_v11 = vadd.f32 %v2078_v4, %v628_v5  ;;  %1171 = vmatpush.bf16.msra.mxu0 %v2027_v54  ;;  %1008 = vmatpush.bf16.msrb.mxu3 %v2016_v59  ;;  %v2081_v6 = vld [vmem:[#allocation8 + $0x19] ss:$0 sm:$0xff] }
 0x2dd   :  { %1255 = vmatpush.bf16.msra.mxu1 %v2035_v55 }
 0x2de   :  { %v637_v12 = vmul.f32 %v2079_v7, %v633_v10  ;;  %v636_v13 = vmul.f32 %v2079_v7, %v632_v11 }
 0x2e0   :  { %v1696_v14 = vmul.f32 -1.442695, %v637_v12  ;;  %v1695_v15 = vmul.f32 -1.442695, %v636_v13  ;;  %1172 = vmatpush.bf16.msra.mxu0 %v2026_v56  ;;  %1009 = vmatpush.bf16.msrb.mxu3 %v2015_v61  ;;  %v2043_v56 = vld [vmem:[#allocation7 + $0x230] sm:$0xff]  ;;  %v2033_v61 = vld [vmem:[#allocation7 + $0x1e0] sm:$0xff] }
 0x2e1   :  { %1421 = vmatpush.bf16.msra.mxu2 %v2043_v56  ;;  %1256 = vmatpush.bf16.msra.mxu1 %v2034_v57 }
 0x2e2   :  { %2117 = vpow2.f32 %v1696_v14 }
 0x2e3   :  { %2119 = vpow2.f32 %v1695_v15 }
 0x2e4   :  { %1173 = vmatpush.bf16.msra.mxu0 %v2025_v58  ;;  %1010 = vmatpush.bf16.msrb.mxu3 %v2014_v63  ;;  %v2042_v58 = vld [vmem:[#allocation7 + $0x228] sm:$0xff] }
 0x2e5   :  { %1422 = vmatpush.bf16.msra.mxu2 %v2042_v58  ;;  %1257 = vmatpush.bf16.msra.mxu1 %v2033_v61  ;;  %v2087_v61 = vld [vmem:[#allocation8 + $0x13] ss:$0 sm:$0xff] }
 0x2e8   :  { %v2118_v16 = vpop.eup %2117  ;;  %1174 = vmatpush.bf16.msra.mxu0 %v2024_v60  ;;  %1011 = vmatpush.bf16.msrb.mxu3 %v2013_v1  ;;  %v2032_v1 = vld [vmem:[#allocation7 + $0x1d8] sm:$0xff] }
 0x2e9   :  { %v2120_v17 = vpop.eup %2119  ;;  %v645_v18 = vadd.f32 1.0, %v2118_v16  ;;  %1258 = vmatpush.bf16.msra.mxu1 %v2032_v1 }
 0x2ea   :  { %v644_v19 = vadd.f32 1.0, %v2120_v17 }
 0x2eb   :  { %2121 = vrcp.f32 %v645_v18  ;;  %v672_v27 = vand.u32 2147483648, %v645_v18  ;;  %v670_v48 = vand.u32 2147483647, %v645_v18  ;;  %vm666_vm12 = vweird.f32 %v645_v18 }
 0x2ec   :  { %2123 = vrcp.f32 %v644_v19  ;;  %v657_v28 = vand.u32 2147483648, %v644_v19  ;;  %v655_v49 = vand.u32 2147483647, %v644_v19  ;;  %vm651_vm13 = vweird.f32 %v644_v19  ;;  %1175 = vmatpush.bf16.msra.mxu0 %v2023_v62  ;;  %v2041_v62 = vld [vmem:[#allocation7 + $0x220] sm:$0xff] }
 0x2ed   :  { %v673_v35 = vor.u32 1.1754944e-38, %v672_v27  ;;  %vm671_vm0 = vcmp.eq.f32.partialorder %v670_v48, 8.507059e+37  ;;  %v2083_v27 = vld [vmem:[#allocation8 + $0xe] ss:$0 sm:$0xff]  ;;  %1423 = vmatpush.bf16.msra.mxu2 %v2041_v62 }
 0x2ee   :  { %v658_v37 = vor.u32 1.1754944e-38, %v657_v28  ;;  %vm656_vm1 = vcmp.eq.f32.partialorder %v655_v49, 8.507059e+37 }
 0x2f0   :  { %1176 = vmatpush.bf16.msra.mxu0 %v2022_v0 }
 0x2f1   :  { %v2122_v21 = vpop.eup %2121 }
 0x2f2   :  { %v2124_v22 = vpop.eup %2123  ;;  %v662_v23 = vmul.f32 %v2122_v21, %v645_v18  ;;  %vm667_vm10 = vweird.f32 %v2122_v21  ;;  %v924_v18 = vld [vmem:[#allocation5] sm:$0xff] }
 0x2f3   :  { %v647_v24 = vmul.f32 %v2124_v22, %v644_v19  ;;  %vm652_vm11 = vweird.f32 %v2124_v22  ;;  %vm668_vm14 = vmor %vm666_vm12, %vm667_vm10  ;;  %v925_v19 = vld [vmem:[#allocation5 + $0x8] sm:$0xff] }
 0x2f4   :  { %v663_v25 = vsub.f32 1.0, %v662_v23  ;;  %vm653_vm15 = vmor %vm651_vm13, %vm652_vm11  ;;  %1177 = vmatpush.bf16.msra.mxu0 %v2021_v2  ;;  %v2040_v2 = vld [vmem:[#allocation7 + $0x218] sm:$0xff] }
 0x2f5   :  { %v648_v26 = vsub.f32 1.0, %v647_v24  ;;  %1424 = vmatpush.bf16.msra.mxu2 %v2040_v2 }
 0x2f6   :  { %v664_v29 = vmul.f32 %v2122_v21, %v663_v25 }
 0x2f7   :  { %v649_v30 = vmul.f32 %v2124_v22, %v648_v26 }
 0x2f8   :  { %v665_v31 = vadd.f32 %v2122_v21, %v664_v29 }
 0x2f9   :  { %v650_v34 = vadd.f32 %v2124_v22, %v649_v30 }
 0x2fa   :  { %v669_v38 = vsel %vm668_vm14, %v2122_v21, %v665_v31 }
 0x2fb   :  { %v654_v39 = vsel %vm653_vm15, %v2124_v22, %v650_v34  ;;  %v674_v40 = vsel %vm671_vm0, %v673_v35, %v669_v38 }
 0x2fc   :  { %v659_v42 = vsel %vm656_vm1, %v658_v37, %v654_v39  ;;  %v677_v43 = vmul.f32 %v674_v40, %v633_v10 }
 0x2fd   :  { %v676_v45 = vmul.f32 %v659_v42, %v632_v11 }
 0x2fe   :  { %v760_v46 = vadd.f32 %v757_v41, %v677_v43 }
 0x2ff   :  { %v759_v47 = vadd.f32 %v755_v44, %v676_v45 }
 0x301   :  { %v761_v50 = vpack.c.bf16 %v760_v46, %v759_v47 }
 0x303   :  { %837 = vmatmul.bf16.vlgmr.msrb.gmra.mxu1 %v761_v50  ;;  %918 = vmatmul.bf16.vlgmr.msrb.gmra.mxu2 %v761_v50 }
 0x380   :  { %v838_v4 = vpop.f32.mrf.mxu1 }
 0x381   :  { %v839_v5 = vadd.f32 %v2080_v3, %v838_v4 }
 0x383   :  { %1520 = vst [vmem:[#allocation11] sm:$0xff] %v839_v5 }
 0x386   :  { %v919_v7 = vpop.f32.mrf.mxu2 }
 0x387   :  { %v920_v8 = vadd.f32 %v2081_v6, %v919_v7  ;;  %v2039_v7 = vld [vmem:[#allocation7 + $0x210] sm:$0xff] }
 0x388   :  { %v840_v9 = vpop.f32.mrf.mxu1  ;;  %1425 = vmatpush.bf16.msra.mxu2 %v2039_v7 }
 0x389   :  { %v926_v10 = vmul.f32 0.5, %v920_v8  ;;  %1522 = vst [vmem:[#allocation11 + $0x8] sm:$0xff] %v920_v8  ;;  %v841_v11 = vadd.f32 %v2080_v3, %v840_v9 }
 0x38b   :  { %1521 = vst [vmem:[#allocation11 + $0x10] sm:$0xff] %v841_v11  ;;  %v928_v12 = vmul.f32 1.442695, %v926_v10 }
 0x38d   :  { %2125 = vpow2.f32 %v928_v12 }
 0x38e   :  { %v921_v13 = vpop.f32.mrf.mxu2 }
 0x38f   :  { %v922_v14 = vadd.f32 %v2081_v6, %v921_v13  ;;  %v2031_v6 = vld [vmem:[#allocation7 + $0x1d0] sm:$0xff] }
 0x390   :  { %1259 = vmatpush.bf16.msra.mxu1 %v2031_v6 }
 0x391   :  { %v927_v15 = vmul.f32 0.5, %v922_v14  ;;  %1523 = vst [vmem:[#allocation11 + $0x18] sm:$0xff] %v922_v14  ;;  %v2086_v14 = vld [vmem:[#allocation8 + $0x11] ss:$0 sm:$0xff] }
 0x392   :  { %1549 = dma.vmem_to_hbm [thread:$0]  %s1542_s3, 512, %s1544_s17, [#allocation12], %s2313_s18, %s2313_s18, %s2314_s19  }
 0x393   :  { %v930_v16 = vmul.f32 1.442695, %v927_v15  ;;  %v2126_v17 = vpop.eup %2125  ;;  %v2030_v15 = vld [vmem:[#allocation7 + $0x1c8] sm:$0xff] }
 0x394   :  { %v932_v20 = vmul.f32 %v2126_v17, %v924_v18  ;;  %1260 = vmatpush.bf16.msra.mxu1 %v2030_v15 }
 0x395   :  { %2127 = vpow2.f32 %v930_v16  ;;  %v2038_v16 = vld [vmem:[#allocation7 + $0x208] sm:$0xff] }
 0x396   :  { %v934_v23 = vadd.f32 %v932_v20, %v839_v5  ;;  %v2084_v5 = vld [vmem:[#allocation8 + $0xf] ss:$0 sm:$0xff]  ;;  %1426 = vmatpush.bf16.msra.mxu2 %v2038_v16  ;;  %v2037_v20 = vld [vmem:[#allocation7 + $0x200] sm:$0xff] }
 0x39a   :  { %1427 = vmatpush.bf16.msra.mxu2 %v2037_v20 }
 0x39b   :  { %v2128_v21 = vpop.eup %2127 }
 0x39c   :  { %v933_v22 = vmul.f32 %v2128_v21, %v925_v19  ;;  %v2029_v19 = vld [vmem:[#allocation7 + $0x1c0] sm:$0xff] }
 0x39d   :  { %1261 = vmatpush.bf16.msra.mxu1 %v2029_v19 }
 0x39e   :  { %v935_v24 = vadd.f32 %v933_v22, %v841_v11  ;;  %v2085_v11 = vld [vmem:[#allocation8 + $0x10] ss:$0 sm:$0xff] }
 0x3a0   :  { %v936_v25 = vpack.c.bf16 %v935_v24, %v934_v23 }
 0x3a2   :  { %1012 = vmatmul.bf16.vlgmr.msrb.gmra.mxu3 %v936_v25  ;;  %1178 = vmatmul.bf16.vlgmr.msra.gmra.mxu0 %v936_v25 }
 0x425   :  { %v1013_v26 = vpop.f32.mrf.mxu3 }
 0x426   :  { %v1014_v29 = vadd.f32 %v2083_v27, %v1013_v26 }
 0x42d   :  { %v1015_v28 = vpop.f32.mrf.mxu3 }
 0x42e   :  { %v1016_v48 = vadd.f32 %v2083_v27, %v1015_v28 }
 0x430   :  { %v1018_v30 = vadd.f32 %v1016_v48, %v1014_v29 }
 0x432   :  { %v1019_v49 = vrot.slane %v1018_v30, 4 }
 0x434   :  { %v1020_v31 = vadd.f32 %v1019_v49, %v1018_v30 }
 0x436   :  { %v1021_v32 = vrot.slane %v1020_v31, 2 }
 0x438   :  { %v1022_v33 = vadd.f32 %v1021_v32, %v1020_v31 }
 0x43a   :  { %v1023_v34 = vrot.slane %v1022_v33, 1 }
 0x43c   :  { %v1024_v35 = vadd.f32 %v1023_v34, %v1022_v33 }
 0x43e   :  { %v1025_v37 = vmul.f32 %v1024_v35, %v2367_v36 }
 0x440   :  { %v1026_v38 = vsub.f32 %v1014_v29, %v1025_v37  ;;  %v1027_v39 = vsub.f32 %v1016_v48, %v1025_v37  ;;  %v1179_v29 = vpop.f32.mrf.mxu0 }
 0x442   :  { %v1028_v40 = vmul.f32 %v1026_v38, %v1026_v38  ;;  %v1029_v41 = vmul.f32 %v1027_v39, %v1027_v39 }
 0x444   :  { %v1030_v42 = vadd.f32 %v1029_v41, %v1028_v40  ;;  %v2082_v41 = vld [vmem:[#allocation8 + $0x12] ss:$0 sm:$0xff] }
 0x445   :  { %v1180_v52 = vadd.f32 %v2082_v41, %v1179_v29 }
 0x446   :  { %v1031_v43 = vrot.slane %v1030_v42, 4 }
 0x448   :  { %v1032_v44 = vadd.f32 %v1031_v43, %v1030_v42 }
 0x44a   :  { %v1033_v45 = vrot.slane %v1032_v44, 2 }
 0x44c   :  { %v1034_v46 = vadd.f32 %v1033_v45, %v1032_v44  ;;  %v1181_v45 = vpop.f32.mrf.mxu0 }
 0x44d   :  { %v1182_v55 = vadd.f32 %v2082_v41, %v1181_v45  ;;  %v2045_v45 = vld [vmem:[#allocation7 + $0x2c0] sm:$0xff] }
 0x44e   :  { %v1035_v47 = vrot.slane %v1034_v46, 1 }
 0x450   :  { %v1036_v50 = vadd.f32 %v1035_v47, %v1034_v46 }
 0x452   :  { %v1037_v51 = vmul.f32 %v1036_v50, %v2367_v36 }
 0x454   :  { %v1038_v54 = vadd.f32 1e-05, %v1037_v51 }
 0x456   :  { %2129 = vrsqrt.f32 %v1038_v54  ;;  %vm1045_vm3 = vweird.f32 %v1038_v54 }
 0x45c   :  { %v2130_v59 = vpop.eup %2129 }
 0x45d   :  { %v1040_v60 = vmul.f32 %v2130_v59, %v1038_v54  ;;  %vm1046_vm2 = vweird.f32 %v2130_v59 }
 0x45e   :  { %vm1047_vm4 = vmor %vm1045_vm3, %vm1046_vm2 }
 0x45f   :  { %v1041_v63 = vmul.f32 %v2130_v59, %v1040_v60 }
 0x461   :  { %v1042_v0 = vmul.f32 0.5, %v1041_v63 }
 0x463   :  { %v1043_v3 = vsub.f32 1.5, %v1042_v0 }
 0x465   :  { %v1044_v4 = vmul.f32 %v2130_v59, %v1043_v3 }
 0x467   :  { %v1048_v8 = vsel %vm1047_vm4, %v2130_v59, %v1044_v4 }
 0x468   :  { %v1049_v9 = vmul.f32 %v1048_v8, %v1026_v38  ;;  %v1050_v10 = vmul.f32 %v1048_v8, %v1027_v39 }
 0x46a   :  { %v1053_v12 = vmul.f32 %v2084_v5, %v1049_v9  ;;  %v1054_v13 = vmul.f32 %v2084_v5, %v1050_v10 }
 0x46c   :  { %v1057_v17 = vadd.f32 %v2085_v11, %v1053_v12  ;;  %v1058_v18 = vadd.f32 %v2085_v11, %v1054_v13 }
 0x46e   :  { %v1061_v21 = vmul.f32 %v2086_v14, %v1057_v17  ;;  %v1062_v22 = vmul.f32 %v2086_v14, %v1058_v18 }
 0x470   :  { %v1825_v23 = vmul.f32 -1.442695, %v1061_v21  ;;  %v1826_v24 = vmul.f32 -1.442695, %v1062_v22  ;;  %v2052_v21 = vld [vmem:[#allocation7 + $0x2f8] sm:$0xff] }
 0x471   :  { %1504 = vmatpush.bf16.msra.mxu3 %v2052_v21 }
 0x472   :  { %2131 = vpow2.f32 %v1825_v23  ;;  %v2051_v23 = vld [vmem:[#allocation7 + $0x2f0] sm:$0xff] }
 0x473   :  { %2133 = vpow2.f32 %v1826_v24  ;;  %v2050_v24 = vld [vmem:[#allocation7 + $0x2e8] sm:$0xff] }
 0x475   :  { %1505 = vmatpush.bf16.msra.mxu3 %v2051_v23 }
 0x478   :  { %v2132_v25 = vpop.eup %2131 }
 0x479   :  { %v2134_v26 = vpop.eup %2133  ;;  %v1069_v27 = vadd.f32 1.0, %v2132_v25  ;;  %1506 = vmatpush.bf16.msra.mxu3 %v2050_v24 }
 0x47a   :  { %v1070_v28 = vadd.f32 1.0, %v2134_v26 }
 0x47b   :  { %2135 = vrcp.f32 %v1069_v27  ;;  %v1082_v34 = vand.u32 2147483648, %v1069_v27  ;;  %v1080_v38 = vand.u32 2147483647, %v1069_v27  ;;  %vm1076_vm7 = vweird.f32 %v1069_v27 }
 0x47c   :  { %2137 = vrcp.f32 %v1070_v28  ;;  %v1097_v35 = vand.u32 2147483648, %v1070_v28  ;;  %v1095_v40 = vand.u32 2147483647, %v1070_v28  ;;  %vm1091_vm8 = vweird.f32 %v1070_v28 }
 0x47d   :  { %v1083_v44 = vor.u32 1.1754944e-38, %v1082_v34  ;;  %vm1081_vm11 = vcmp.eq.f32.partialorder %v1080_v38, 8.507059e+37 }
 0x47e   :  { %v1098_v46 = vor.u32 1.1754944e-38, %v1097_v35  ;;  %vm1096_vm12 = vcmp.eq.f32.partialorder %v1095_v40, 8.507059e+37  ;;  %v2090_v35 = vld [vmem:[#allocation8 + $0x15] ss:$0 sm:$0xff]  ;;  %v2046_v40 = vld [vmem:[#allocation7 + $0x2c8] sm:$0xff] }
 0x481   :  { %v2136_v48 = vpop.eup %2135 }
 0x482   :  { %v2138_v30 = vpop.eup %2137  ;;  %v1072_v49 = vmul.f32 %v2136_v48, %v1069_v27  ;;  %vm1077_vm5 = vweird.f32 %v2136_v48  ;;  %v2049_v27 = vld [vmem:[#allocation7 + $0x2e0] sm:$0xff] }
 0x483   :  { %v1087_v31 = vmul.f32 %v2138_v30, %v1070_v28  ;;  %vm1092_vm6 = vweird.f32 %v2138_v30  ;;  %vm1078_vm9 = vmor %vm1076_vm7, %vm1077_vm5  ;;  %1507 = vmatpush.bf16.msra.mxu3 %v2049_v27 }
 0x484   :  { %v1073_v32 = vsub.f32 1.0, %v1072_v49  ;;  %vm1093_vm10 = vmor %vm1091_vm8, %vm1092_vm6 }
 0x485   :  { %v1088_v33 = vsub.f32 1.0, %v1087_v31  ;;  %v2047_v31 = vld [vmem:[#allocation7 + $0x2d0] sm:$0xff] }
 0x486   :  { %v1074_v37 = vmul.f32 %v2136_v48, %v1073_v32 }
 0x487   :  { %v1089_v39 = vmul.f32 %v2138_v30, %v1088_v33 }
 0x488   :  { %v1075_v42 = vadd.f32 %v2136_v48, %v1074_v37 }
 0x489   :  { %v1090_v43 = vadd.f32 %v2138_v30, %v1089_v39  ;;  %v2091_v39 = vld [vmem:[#allocation8 + $0x16] ss:$0 sm:$0xff] }
 0x48a   :  { %v1079_v47 = vsel %vm1078_vm9, %v2136_v48, %v1075_v42  ;;  %v2048_v48 = vld [vmem:[#allocation7 + $0x2d8] sm:$0xff] }
 0x48b   :  { %v1094_v50 = vsel %vm1093_vm10, %v2138_v30, %v1090_v43  ;;  %v1084_v51 = vsel %vm1081_vm11, %v1083_v44, %v1079_v47  ;;  %1508 = vmatpush.bf16.msra.mxu3 %v2048_v48 }
 0x48c   :  { %v1099_v53 = vsel %vm1096_vm12, %v1098_v46, %v1094_v50  ;;  %v1101_v54 = vmul.f32 %v1084_v51, %v1057_v17 }
 0x48d   :  { %v1102_v56 = vmul.f32 %v1099_v53, %v1058_v18 }
 0x48e   :  { %v1184_v57 = vadd.f32 %v1180_v52, %v1101_v54 }
 0x48f   :  { %v1185_v58 = vadd.f32 %v1182_v55, %v1102_v56  ;;  %1509 = vmatpush.bf16.msra.mxu3 %v2047_v31 }
 0x491   :  { %v1186_v59 = vpack.c.bf16 %v1185_v58, %v1184_v57 }
 0x493   :  { %1262 = vmatmul.bf16.vlgmr.msra.gmra.mxu1 %v1186_v59  ;;  %1428 = vmatmul.bf16.vlgmr.msra.gmra.mxu2 %v1186_v59 }
 0x494   :  { %1510 = vmatpush.bf16.msra.mxu3 %v2046_v40 }
 0x498   :  { %1511 = vmatpush.bf16.msra.mxu3 %v2045_v45 }
 0x510   :  { %v1263_v60 = vpop.f32.mrf.mxu1 }
 0x511   :  { %v1264_v63 = vadd.f32 %v2087_v61, %v1263_v60 }
 0x516   :  { %v1429_v54 = vpop.f32.mrf.mxu2 }
 0x518   :  { %v1265_v62 = vpop.f32.mrf.mxu1 }
 0x519   :  { %v1266_v0 = vadd.f32 %v2087_v61, %v1265_v62 }
 0x51b   :  { %v1268_v1 = vadd.f32 %v1266_v0, %v1264_v63 }
 0x51d   :  { %v1269_v2 = vrot.slane %v1268_v1, 4 }
 0x51f   :  { %v1270_v3 = vadd.f32 %v1269_v2, %v1268_v1 }
 0x521   :  { %v1271_v4 = vrot.slane %v1270_v3, 2 }
 0x523   :  { %v1272_v5 = vadd.f32 %v1271_v4, %v1270_v3  ;;  %v2088_v3 = vld [vmem:[#allocation8 + $0x17] ss:$0 sm:$0xff] }
 0x525   :  { %v1273_v6 = vrot.slane %v1272_v5, 1 }
 0x527   :  { %v1274_v7 = vadd.f32 %v1273_v6, %v1272_v5 }
 0x529   :  { %v1275_v8 = vmul.f32 %v1274_v7, %v2367_v36 }
 0x52b   :  { %v1276_v9 = vsub.f32 %v1264_v63, %v1275_v8  ;;  %v1277_v10 = vsub.f32 %v1266_v0, %v1275_v8 }
 0x52d   :  { %v1278_v11 = vmul.f32 %v1276_v9, %v1276_v9  ;;  %v1279_v12 = vmul.f32 %v1277_v10, %v1277_v10 }
 0x52f   :  { %v1280_v13 = vadd.f32 %v1279_v12, %v1278_v11  ;;  %v1430_v12 = vadd.f32 %v2088_v3, %v1429_v54 }
 0x531   :  { %v1281_v14 = vrot.slane %v1280_v13, 4 }
 0x533   :  { %v1282_v15 = vadd.f32 %v1281_v14, %v1280_v13 }
 0x535   :  { %v1283_v16 = vrot.slane %v1282_v15, 2 }
 0x537   :  { %v1284_v17 = vadd.f32 %v1283_v16, %v1282_v15 }
 0x539   :  { %v1285_v18 = vrot.slane %v1284_v17, 1 }
 0x53b   :  { %v1286_v19 = vadd.f32 %v1285_v18, %v1284_v17 }
 0x53d   :  { %v1287_v20 = vmul.f32 %v1286_v19, %v2367_v36  ;;  %v2089_v36 = vld [vmem:[#allocation8 + $0x14] ss:$0 sm:$0xff] }
 0x53f   :  { %v1288_v22 = vadd.f32 1e-05, %v1287_v20  ;;  %v2092_v20 = vld [vmem:[#allocation8 + $0x1a] ss:$0 sm:$0xff] }
 0x541   :  { %2139 = vrsqrt.f32 %v1288_v22  ;;  %vm1295_vm14 = vweird.f32 %v1288_v22 }
 0x547   :  { %v2140_v25 = vpop.eup %2139 }
 0x548   :  { %v1290_v26 = vmul.f32 %v2140_v25, %v1288_v22  ;;  %vm1296_vm13 = vweird.f32 %v2140_v25 }
 0x549   :  { %vm1297_vm15 = vmor %vm1295_vm14, %vm1296_vm13 }
 0x54a   :  { %v1291_v28 = vmul.f32 %v2140_v25, %v1290_v26 }
 0x54c   :  { %v1292_v29 = vmul.f32 0.5, %v1291_v28 }
 0x54e   :  { %v1293_v30 = vsub.f32 1.5, %v1292_v29 }
 0x550   :  { %v1294_v49 = vmul.f32 %v2140_v25, %v1293_v30 }
 0x552   :  { %v1298_v32 = vsel %vm1297_vm15, %v2140_v25, %v1294_v49 }
 0x553   :  { %v1299_v33 = vmul.f32 %v1298_v32, %v1276_v9  ;;  %v1300_v34 = vmul.f32 %v1298_v32, %v1277_v10  ;;  %v1431_v9 = vpop.f32.mrf.mxu2 }
 0x554   :  { %v1432_v16 = vadd.f32 %v2088_v3, %v1431_v9 }
 0x555   :  { %v1303_v37 = vmul.f32 %v2089_v36, %v1299_v33  ;;  %v1304_v38 = vmul.f32 %v2089_v36, %v1300_v34 }
 0x557   :  { %v1307_v41 = vadd.f32 %v2090_v35, %v1303_v37  ;;  %v1308_v42 = vadd.f32 %v2090_v35, %v1304_v38 }
 0x559   :  { %v1311_v43 = vmul.f32 %v2091_v39, %v1307_v41  ;;  %v1312_v44 = vmul.f32 %v2091_v39, %v1308_v42 }
 0x55b   :  { %v1891_v46 = vmul.f32 -1.442695, %v1311_v43  ;;  %v1892_v47 = vmul.f32 -1.442695, %v1312_v44 }
 0x55d   :  { %2141 = vpow2.f32 %v1891_v46 }
 0x55e   :  { %2143 = vpow2.f32 %v1892_v47 }
 0x563   :  { %v2142_v50 = vpop.eup %2141 }
 0x564   :  { %v2144_v51 = vpop.eup %2143  ;;  %v1319_v52 = vadd.f32 1.0, %v2142_v50 }
 0x565   :  { %v1320_v53 = vadd.f32 1.0, %v2144_v51 }
 0x566   :  { %2145 = vrcp.f32 %v1319_v52  ;;  %v1332_v60 = vand.u32 2147483648, %v1319_v52  ;;  %v1330_v63 = vand.u32 2147483647, %v1319_v52  ;;  %vm1326_vm2 = vweird.f32 %v1319_v52 }
 0x567   :  { %2147 = vrcp.f32 %v1320_v53  ;;  %v1347_v0 = vand.u32 2147483648, %v1320_v53  ;;  %v1345_v2 = vand.u32 2147483647, %v1320_v53  ;;  %vm1341_vm4 = vweird.f32 %v1320_v53 }
 0x568   :  { %v1333_v5 = vor.u32 1.1754944e-38, %v1332_v60  ;;  %vm1331_vm5 = vcmp.eq.f32.partialorder %v1330_v63, 8.507059e+37 }
 0x569   :  { %v1348_v8 = vor.u32 1.1754944e-38, %v1347_v0  ;;  %vm1346_vm7 = vcmp.eq.f32.partialorder %v1345_v2, 8.507059e+37 }
 0x56c   :  { %v2146_v55 = vpop.eup %2145 }
 0x56d   :  { %v2148_v56 = vpop.eup %2147  ;;  %v1322_v57 = vmul.f32 %v2146_v55, %v1319_v52  ;;  %vm1327_vm0 = vweird.f32 %v2146_v55 }
 0x56e   :  { %v1337_v58 = vmul.f32 %v2148_v56, %v1320_v53  ;;  %vm1342_vm1 = vweird.f32 %v2148_v56  ;;  %vm1328_vm3 = vmor %vm1326_vm2, %vm1327_vm0 }
 0x56f   :  { %v1323_v59 = vsub.f32 1.0, %v1322_v57  ;;  %vm1343_vm6 = vmor %vm1341_vm4, %vm1342_vm1 }
 0x570   :  { %v1338_v61 = vsub.f32 1.0, %v1337_v58 }
 0x571   :  { %v1324_v62 = vmul.f32 %v2146_v55, %v1323_v59 }
 0x572   :  { %v1339_v1 = vmul.f32 %v2148_v56, %v1338_v61 }
 0x573   :  { %v1325_v4 = vadd.f32 %v2146_v55, %v1324_v62 }
 0x574   :  { %v1340_v6 = vadd.f32 %v2148_v56, %v1339_v1 }
 0x575   :  { %v1329_v7 = vsel %vm1328_vm3, %v2146_v55, %v1325_v4 }
 0x576   :  { %v1334_v10 = vsel %vm1331_vm5, %v1333_v5, %v1329_v7  ;;  %v1344_v11 = vsel %vm1343_vm6, %v2148_v56, %v1340_v6 }
 0x577   :  { %v1349_v13 = vsel %vm1346_vm7, %v1348_v8, %v1344_v11  ;;  %v1351_v14 = vmul.f32 %v1334_v10, %v1307_v41 }
 0x578   :  { %v1352_v15 = vmul.f32 %v1349_v13, %v1308_v42 }
 0x579   :  { %v1434_v17 = vadd.f32 %v1430_v12, %v1351_v14 }
 0x57a   :  { %v1435_v18 = vadd.f32 %v1432_v16, %v1352_v15 }
 0x57c   :  { %v1436_v19 = vpack.c.bf16 %v1435_v18, %v1434_v17 }
 0x57e   :  { %1512 = vmatmul.bf16.vlgmr.msra.gmra.mxu3 %v1436_v19 }
 0x601   :  { %v1513_v21 = vpop.f32.mrf.mxu3 }
 0x602   :  { %v1514_v22 = vadd.f32 %v2092_v20, %v1513_v21 }
 0x604   :  { %1518 = vst [vmem:[#allocation10] sm:$0xff] %v1514_v22 }
 0x609   :  { %v1515_v23 = vpop.f32.mrf.mxu3 }
 0x60a   :  { %v1516_v24 = vadd.f32 %v2092_v20, %v1515_v23 }
 0x60c   :  { %1519 = vst [vmem:[#allocation10 + $0x8] sm:$0xff] %v1516_v24 }
 0x60d   :  { %1536 = dma.vmem_to_hbm [thread:$0]  %s1529_s21, 256, %s1531_s24, [#allocation4], %s2304_s26, %s2304_s26, %s2305_s27  }
 0x60e   :  { %2299 = dma.done.wait [#allocation4], 256  }
 0x60f   :  { %2300 = vsyncadd [#allocation4], 4294967040 }
 0x610   :  { %2301 = dma.done.wait [#allocation12], 512  }
 0x611   :  { %2302 = vsyncadd [#allocation12], 4294966784 }
 0x612   :  { %1558 = vsyncpa [#allocation3], 1 }
 0x613   :  { %1559 = vsyncpa [#allocation6], 1 }
 0x614   :  { %1560 = vsyncpa [#allocation9], 1 }
 0x615   :  { %1561 = vsyncpa [#allocation4], 1 }
 0x616   :  { %1562 = vsyncpa [#allocation12], 1 }

</bundles_post_ra>
